<compile_context>
chip_gen: v5e
topology: v5e:2x2
jax: 0.10.0
libtpu: 0.0.40
codegen_flags: <defaults>
</compile_context>

<pallas_src>
import functools

import jax
import jax.numpy as jnp
from jax.experimental import pallas as pl
from jax.experimental.pallas import tpu as pltpu


# Lane-dense padded sizes (all last dims are 128-multiples -> unmasked
# vector loads/stores on every TPU generation).
FP = 128             # padded backbone feature dim (in_features = 32 -> 128)
NP = 128             # padded classifier output dim (12 -> 128)
H1 = 512             # classifier hidden 1 (already lane-aligned)
H2 = 128             # classifier hidden 2 (already lane-aligned)
NUM_CLASSES = 12
TB = 8               # images per grid step (multiple of 8 -> sublane-dense out)


# ---------------------------------------------------------------------------
# Fused kernel: TB batch elements per grid step.
#   p_ref  : (TB*hw, K)  bf16  im2col patches (true K = 9*C, no HBM padding)
#   wc_ref : (K, FP)     bf16  conv weight     bc_ref : (1, FP)  f32 conv bias
#   w1..w3 : bf16 MLP weights                  b1..b3 : f32 MLP biases
#   o_ref  : (TB, NP)    f32   padded logits rows for these elements
# ---------------------------------------------------------------------------
def fused_kernel(p_ref, wc_ref, bc_ref, w1_ref, b1_ref, w2_ref, b2_ref,
                 w3_ref, b3_ref, o_ref, *, tb, hw):
    inv_hw = 1.0 / hw    # Python constant -> folded as a VPU multiply

    # Synthetic backbone: 3x3 "same" conv as one im2col matmul, ReLU, GAP.
    conv = jnp.dot(p_ref[...], wc_ref[...],
                   preferred_element_type=jnp.float32) + bc_ref[...]
    act = jnp.maximum(conv, 0.0)                          # (tb*hw, FP) f32
    # Global average pool per image (tile-aligned reshape: hw % 8 == 0).
    feats = act.reshape(tb, hw, FP).sum(axis=1) * inv_hw  # (tb, FP)  f32

    # Replaced classifier head (exact semantics of the nn.Sequential).
    h = jnp.dot(feats.astype(jnp.bfloat16), w1_ref[...],
                preferred_element_type=jnp.float32) + b1_ref[...]
    h = jnp.maximum(h, 0.0)
    h = jnp.dot(h.astype(jnp.bfloat16), w2_ref[...],
                preferred_element_type=jnp.float32) + b2_ref[...]
    h = jnp.maximum(h, 0.0)
    o_ref[...] = jnp.dot(h.astype(jnp.bfloat16), w3_ref[...],
                         preferred_element_type=jnp.float32) + b3_ref[...]


def run_fused(patches, p, b_pad, hw, k):
    """patches: (b_pad*hw, k) bf16.  Returns padded logits (b_pad, NP) f32."""
    kernel = functools.partial(fused_kernel, tb=TB, hw=hw)
    flops = (2 * b_pad * hw * k * FP
             + 2 * b_pad * (FP * H1 + H1 * H2 + H2 * NP))
    bytes_accessed = (patches.size * patches.dtype.itemsize
                      + sum(int(v.size) * v.dtype.itemsize for v in p.values())
                      + b_pad * NP * 4)
    return pl.pallas_call(
        kernel,
        out_shape=jax.ShapeDtypeStruct((b_pad, NP), jnp.float32),
        grid=(b_pad // TB,),
        in_specs=[
            pl.BlockSpec((TB * hw, k), lambda b: (b, 0)),   # this step's rows
            pl.BlockSpec((k, FP), lambda b: (0, 0)),        # weights: resident
            pl.BlockSpec((1, FP), lambda b: (0, 0)),
            pl.BlockSpec((FP, H1), lambda b: (0, 0)),
            pl.BlockSpec((1, H1), lambda b: (0, 0)),
            pl.BlockSpec((H1, H2), lambda b: (0, 0)),
            pl.BlockSpec((1, H2), lambda b: (0, 0)),
            pl.BlockSpec((H2, NP), lambda b: (0, 0)),
            pl.BlockSpec((1, NP), lambda b: (0, 0)),
        ],
        out_specs=pl.BlockSpec((TB, NP), lambda b: (b, 0)),  # full (8,128) tile
        compiler_params=pltpu.CompilerParams(
            dimension_semantics=("parallel",)),
        cost_estimate=pl.CostEstimate(flops=flops, transcendentals=0,
                                      bytes_accessed=bytes_accessed),
    )(patches, p["w_conv"], p["b_conv"], p["w1"], p["b1"],
      p["w2"], p["b2"], p["w3"], p["b3"])


def im2col_3x3(x_nhwc):
    """Zero-padded 3x3 im2col. Returns (B, H*W, 9*C) with (kh, kw, c) order."""
    B, H, W, C = x_nhwc.shape
    xp = jnp.pad(x_nhwc, ((0, 0), (1, 1), (1, 1), (0, 0)))
    cols = [xp[:, i:i + H, j:j + W, :] for i in range(3) for j in range(3)]
    patches = jnp.concatenate(cols, axis=-1)              # (B, H, W, 9*C)
    return patches.reshape(B, H * W, 9 * C)


@jax.jit
def modified_pretrained_forward(x_nchw, packed):
    B, C, H, W = x_nchw.shape
    hw, k = H * W, 9 * C
    b_pad = ((B + TB - 1) // TB) * TB                     # pad batch to TB
    x_nhwc = jnp.transpose(x_nchw, (0, 2, 3, 1))
    patches = im2col_3x3(x_nhwc)                          # (B, hw, k) f32
    patches = jnp.pad(patches, ((0, b_pad - B), (0, 0), (0, 0)))
    patches = patches.reshape(b_pad * hw, k).astype(jnp.bfloat16)
    logits_p = run_fused(patches, packed, b_pad, hw, k)   # (b_pad, NP) f32
    return logits_p[:B, :NUM_CLASSES]


def init_params(key, c_in=4, in_features=32, n_classes=NUM_CLASSES):
    """Original-shape f32 parameters (synthetic backbone + classifier head)."""
    ks = jax.random.split(key, 8)
    s = lambda fan_in: 1.0 / jnp.sqrt(jnp.float32(fan_in))
    return {
        "w_conv": jax.random.normal(ks[0], (9 * c_in, in_features),
                                    jnp.float32) * s(9 * c_in),
        "b_conv": jax.random.normal(ks[1], (1, in_features),
                                    jnp.float32) * 0.01,
        "w1": jax.random.normal(ks[2], (in_features, H1), jnp.float32)
              * s(in_features),
        "b1": jax.random.normal(ks[3], (1, H1), jnp.float32) * 0.01,
        "w2": jax.random.normal(ks[4], (H1, H2), jnp.float32) * s(H1),
        "b2": jax.random.normal(ks[5], (1, H2), jnp.float32) * 0.01,
        "w3": jax.random.normal(ks[6], (H2, n_classes), jnp.float32) * s(H2),
        "b3": jax.random.normal(ks[7], (1, n_classes), jnp.float32) * 0.01,
    }


def pack_params(p):
    """Pad to lane-dense 128-multiple shapes (once, at init) and cast matmul
    weights to bf16.  Zero padding preserves semantics: padded feature
    columns stay 0 through conv+ReLU+GAP, padded w1 rows multiply those
    zeros, and padded logit columns are sliced off in the wrapper."""
    def pad2(a, rows, cols):
        return jnp.pad(a, ((0, rows - a.shape[0]), (0, cols - a.shape[1])))
    return {
        "w_conv": pad2(p["w_conv"], p["w_conv"].shape[0], FP).astype(jnp.bfloat16),
        "b_conv": pad2(p["b_conv"], 1, FP),
        "w1": pad2(p["w1"], FP, H1).astype(jnp.bfloat16),
        "b1": p["b1"],
        "w2": p["w2"].astype(jnp.bfloat16),
        "b2": p["b2"],
        "w3": pad2(p["w3"], H2, NP).astype(jnp.bfloat16),
        "b3": pad2(p["b3"], 1, NP),
    }


def reference_forward(x_nchw, p):
    """Pure-JAX f32 reference of the same forward (backbone + exact head)."""
    x = jnp.transpose(x_nchw, (0, 2, 3, 1))
    patches = im2col_3x3(x)                               # (B, HW, 9C)
    conv = patches @ p["w_conv"] + p["b_conv"]
    feats = jnp.maximum(conv, 0.0).mean(axis=1)           # (B, F)
    h = jnp.maximum(feats @ p["w1"] + p["b1"], 0.0)
    h = jnp.maximum(h @ p["w2"] + p["b2"], 0.0)
    return h @ p["w3"] + p["b3"]                          # (B, 12)


if __name__ == "__main__":
    key = jax.random.PRNGKey(0)
    k_x, k_p = jax.random.split(key)

    B, C, H, W = 2, 4, 16, 16            # small NCHW input, PyTorch convention
    x = jax.random.normal(k_x, (B, C, H, W), jnp.float32)

    params = init_params(k_p, c_in=C, in_features=32, n_classes=NUM_CLASSES)
    packed = pack_params(params)

    logits = modified_pretrained_forward(x, packed)
    logits = jax.block_until_ready(logits)

    assert logits.shape == (B, NUM_CLASSES), logits.shape
    assert logits.dtype == jnp.float32

    # Loose-tolerance check vs. f32 reference (bf16 MXU operands => ~1e-2).
    ref = reference_forward(x, params)
    max_err = float(jnp.max(jnp.abs(logits - ref)))
    assert max_err < 0.1, f"max abs error vs f32 reference: {max_err}"

    print("KERNEL_OK")
</pallas_src>

<mosaic_0001>
module attributes {stable_mosaic.version = 11 : i64} {
  func.func @fused_kernel(%arg0: i32, %arg1: memref<2048x36xbf16, #tpu.memory_space<vmem>>, %arg2: memref<36x128xbf16, #tpu.memory_space<vmem>>, %arg3: memref<1x128xf32, #tpu.memory_space<vmem>>, %arg4: memref<128x512xbf16, #tpu.memory_space<vmem>>, %arg5: memref<1x512xf32, #tpu.memory_space<vmem>>, %arg6: memref<512x128xbf16, #tpu.memory_space<vmem>>, %arg7: memref<1x128xf32, #tpu.memory_space<vmem>>, %arg8: memref<128x128xbf16, #tpu.memory_space<vmem>>, %arg9: memref<1x128xf32, #tpu.memory_space<vmem>>, %arg10: memref<8x128xf32, #tpu.memory_space<vmem>>) attributes {dimension_semantics = [#tpu.dimension_semantics<parallel>], iteration_bounds = array<i64: 1>, scalar_prefetch = 0 : i64, scratch_operands = 0 : i64, tpu.core_type = #tpu.core_type<tc>, window_params = [{transform_indices = @transform_0, window_bounds = array<i64: 2048, 36>}, {pipeline_mode = #tpu.pipeline_mode<synchronous>, transform_indices = @transform_1, window_bounds = array<i64: 36, 128>}, {pipeline_mode = #tpu.pipeline_mode<synchronous>, transform_indices = @transform_2, window_bounds = array<i64: 1, 128>}, {pipeline_mode = #tpu.pipeline_mode<synchronous>, transform_indices = @transform_3, window_bounds = array<i64: 128, 512>}, {pipeline_mode = #tpu.pipeline_mode<synchronous>, transform_indices = @transform_4, window_bounds = array<i64: 1, 512>}, {pipeline_mode = #tpu.pipeline_mode<synchronous>, transform_indices = @transform_5, window_bounds = array<i64: 512, 128>}, {pipeline_mode = #tpu.pipeline_mode<synchronous>, transform_indices = @transform_6, window_bounds = array<i64: 1, 128>}, {pipeline_mode = #tpu.pipeline_mode<synchronous>, transform_indices = @transform_7, window_bounds = array<i64: 128, 128>}, {pipeline_mode = #tpu.pipeline_mode<synchronous>, transform_indices = @transform_8, window_bounds = array<i64: 1, 128>}, {transform_indices = @transform_9, window_bounds = array<i64: 8, 128>}]} {
    %c0 = arith.constant 0 : index
    %c0_0 = arith.constant 0 : index
    %0 = vector.load %arg1[%c0, %c0_0] : memref<2048x36xbf16, #tpu.memory_space<vmem>>, vector<2048x36xbf16>
    %c0_1 = arith.constant 0 : index
    %c0_2 = arith.constant 0 : index
    %1 = vector.load %arg2[%c0_1, %c0_2] : memref<36x128xbf16, #tpu.memory_space<vmem>>, vector<36x128xbf16>
    %cst = arith.constant dense<0.000000e+00> : vector<2048x128xf32>
    %2 = tpu.matmul %0, %1, %cst {dimension_numbers = #tpu.dot_dimension_numbers<[1], [0], [0], [1], [0, 0, 1, 1], [], []>} : vector<2048x36xbf16>, vector<36x128xbf16>, vector<2048x128xf32> -> vector<2048x128xf32>
    %c0_3 = arith.constant 0 : index
    %c0_4 = arith.constant 0 : index
    %3 = vector.load %arg3[%c0_3, %c0_4] : memref<1x128xf32, #tpu.memory_space<vmem>>, vector<1x128xf32>
    %4 = vector.broadcast %3 : vector<1x128xf32> to vector<2048x128xf32>
    %5 = arith.addf %2, %4 : vector<2048x128xf32>
    %cst_5 = arith.constant 0.000000e+00 : f32
    %6 = vector.broadcast %cst_5 : f32 to vector<2048x128xf32>
    %7 = arith.maximumf %5, %6 : vector<2048x128xf32>
    %8 = vector.shape_cast %7 : vector<2048x128xf32> to vector<8x256x128xf32>
    %cst_6 = arith.constant dense<0.000000e+00> : vector<8x128xf32>
    %9 = vector.multi_reduction <add>, %8, %cst_6 [1] : vector<8x256x128xf32> to vector<8x128xf32>
    %cst_7 = arith.constant 3.906250e-03 : f32
    %10 = vector.broadcast %cst_7 : f32 to vector<8x128xf32>
    %11 = arith.mulf %9, %10 : vector<8x128xf32>
    %12 = arith.truncf %11 : vector<8x128xf32> to vector<8x128xbf16>
    %c0_8 = arith.constant 0 : index
    %c0_9 = arith.constant 0 : index
    %13 = vector.load %arg4[%c0_8, %c0_9] : memref<128x512xbf16, #tpu.memory_space<vmem>>, vector<128x512xbf16>
    %cst_10 = arith.constant dense<0.000000e+00> : vector<8x512xf32>
    %14 = tpu.matmul %12, %13, %cst_10 {dimension_numbers = #tpu.dot_dimension_numbers<[1], [0], [0], [1], [0, 0, 1, 1], [], []>} : vector<8x128xbf16>, vector<128x512xbf16>, vector<8x512xf32> -> vector<8x512xf32>
    %c0_11 = arith.constant 0 : index
    %c0_12 = arith.constant 0 : index
    %15 = vector.load %arg5[%c0_11, %c0_12] : memref<1x512xf32, #tpu.memory_space<vmem>>, vector<1x512xf32>
    %16 = vector.broadcast %15 : vector<1x512xf32> to vector<8x512xf32>
    %17 = arith.addf %14, %16 : vector<8x512xf32>
    %cst_13 = arith.constant 0.000000e+00 : f32
    %18 = vector.broadcast %cst_13 : f32 to vector<8x512xf32>
    %19 = arith.maximumf %17, %18 : vector<8x512xf32>
    %20 = arith.truncf %19 : vector<8x512xf32> to vector<8x512xbf16>
    %c0_14 = arith.constant 0 : index
    %c0_15 = arith.constant 0 : index
    %21 = vector.load %arg6[%c0_14, %c0_15] : memref<512x128xbf16, #tpu.memory_space<vmem>>, vector<512x128xbf16>
    %cst_16 = arith.constant dense<0.000000e+00> : vector<8x128xf32>
    %22 = tpu.matmul %20, %21, %cst_16 {dimension_numbers = #tpu.dot_dimension_numbers<[1], [0], [0], [1], [0, 0, 1, 1], [], []>} : vector<8x512xbf16>, vector<512x128xbf16>, vector<8x128xf32> -> vector<8x128xf32>
    %c0_17 = arith.constant 0 : index
    %c0_18 = arith.constant 0 : index
    %23 = vector.load %arg7[%c0_17, %c0_18] : memref<1x128xf32, #tpu.memory_space<vmem>>, vector<1x128xf32>
    %24 = vector.broadcast %23 : vector<1x128xf32> to vector<8x128xf32>
    %25 = arith.addf %22, %24 : vector<8x128xf32>
    %cst_19 = arith.constant 0.000000e+00 : f32
    %26 = vector.broadcast %cst_19 : f32 to vector<8x128xf32>
    %27 = arith.maximumf %25, %26 : vector<8x128xf32>
    %28 = arith.truncf %27 : vector<8x128xf32> to vector<8x128xbf16>
    %c0_20 = arith.constant 0 : index
    %c0_21 = arith.constant 0 : index
    %29 = vector.load %arg8[%c0_20, %c0_21] : memref<128x128xbf16, #tpu.memory_space<vmem>>, vector<128x128xbf16>
    %cst_22 = arith.constant dense<0.000000e+00> : vector<8x128xf32>
    %30 = tpu.matmul %28, %29, %cst_22 {dimension_numbers = #tpu.dot_dimension_numbers<[1], [0], [0], [1], [0, 0, 1, 1], [], []>} : vector<8x128xbf16>, vector<128x128xbf16>, vector<8x128xf32> -> vector<8x128xf32>
    %c0_23 = arith.constant 0 : index
    %c0_24 = arith.constant 0 : index
    %31 = vector.load %arg9[%c0_23, %c0_24] : memref<1x128xf32, #tpu.memory_space<vmem>>, vector<1x128xf32>
    %32 = vector.broadcast %31 : vector<1x128xf32> to vector<8x128xf32>
    %33 = arith.addf %30, %32 : vector<8x128xf32>
    %c0_25 = arith.constant 0 : index
    %c0_26 = arith.constant 0 : index
    %34 = vector.load %arg10[%c0_25, %c0_26] : memref<8x128xf32, #tpu.memory_space<vmem>>, vector<8x128xf32>
    tpu.vector_store %arg10[%c0_25, %c0_26], %33 {strides = array<i32>} : memref<8x128xf32, #tpu.memory_space<vmem>>, vector<8x128xf32>,
    return
  }
  func.func @transform_0(%arg0: i32) -> (i32, i32) {
    %c0_i32 = arith.constant 0 : i32
    %c0_i32_0 = arith.constant 0 : i32
    return %arg0, %c0_i32 : i32, i32
  }
  func.func @transform_1(%arg0: i32) -> (i32, i32) {
    %c0_i32 = arith.constant 0 : i32
    %c0_i32_0 = arith.constant 0 : i32
    %c0_i32_1 = arith.constant 0 : i32
    return %c0_i32, %c0_i32_0 : i32, i32
  }
  func.func @transform_2(%arg0: i32) -> (i32, i32) {
    %c0_i32 = arith.constant 0 : i32
    %c0_i32_0 = arith.constant 0 : i32
    %c0_i32_1 = arith.constant 0 : i32
    return %c0_i32, %c0_i32_0 : i32, i32
  }
  func.func @transform_3(%arg0: i32) -> (i32, i32) {
    %c0_i32 = arith.constant 0 : i32
    %c0_i32_0 = arith.constant 0 : i32
    %c0_i32_1 = arith.constant 0 : i32
    return %c0_i32, %c0_i32_0 : i32, i32
  }
  func.func @transform_4(%arg0: i32) -> (i32, i32) {
    %c0_i32 = arith.constant 0 : i32
    %c0_i32_0 = arith.constant 0 : i32
    %c0_i32_1 = arith.constant 0 : i32
    return %c0_i32, %c0_i32_0 : i32, i32
  }
  func.func @transform_5(%arg0: i32) -> (i32, i32) {
    %c0_i32 = arith.constant 0 : i32
    %c0_i32_0 = arith.constant 0 : i32
    %c0_i32_1 = arith.constant 0 : i32
    return %c0_i32, %c0_i32_0 : i32, i32
  }
  func.func @transform_6(%arg0: i32) -> (i32, i32) {
    %c0_i32 = arith.constant 0 : i32
    %c0_i32_0 = arith.constant 0 : i32
    %c0_i32_1 = arith.constant 0 : i32
    return %c0_i32, %c0_i32_0 : i32, i32
  }
  func.func @transform_7(%arg0: i32) -> (i32, i32) {
    %c0_i32 = arith.constant 0 : i32
    %c0_i32_0 = arith.constant 0 : i32
    %c0_i32_1 = arith.constant 0 : i32
    return %c0_i32, %c0_i32_0 : i32, i32
  }
  func.func @transform_8(%arg0: i32) -> (i32, i32) {
    %c0_i32 = arith.constant 0 : i32
    %c0_i32_0 = arith.constant 0 : i32
    %c0_i32_1 = arith.constant 0 : i32
    return %c0_i32, %c0_i32_0 : i32, i32
  }
  func.func @transform_9(%arg0: i32) -> (i32, i32) {
    %c0_i32 = arith.constant 0 : i32
    %c0_i32_0 = arith.constant 0 : i32
    return %arg0, %c0_i32 : i32, i32
  }
}

</mosaic_0001>

<bundles_post_ra>
// kernel: modified_pretrained_forward.1
= control target key start
LH: loop header
LB: loop body
LE: loop exit
PB: predicated region body
PF: predicated region fallthrough
CT: control target
= control target key end

     0   :  { %vm1338_vm0 = vcmask 1041408   ;;  %vm953_vm1 = vcmask 293888   ;;  %vm2617_vm2 = vcmask 1041409   ;;  %vm2619_vm3 = vcmask 1042434   ;;  %s5828_s1 = inlined_call_operand.vmem [shape: bf16[36,128], index: 1, kind: input, shape index: {}]   ;;  %s5829_s2 = inlined_call_operand.vmem [shape: f32[1,128], index: 2, kind: input, shape index: {}]   ;;  %s5830_s0 = inlined_call_operand.vmem [shape: bf16[2048,36], index: 0, kind: input, shape index: {}]   ;;  %s5831_s3 = inlined_call_operand.vmem [shape: bf16[128,512], index: 3, kind: input, shape index: {}]   ;;  %s5832_s5 = inlined_call_operand.vmem [shape: bf16[512,128], index: 5, kind: input, shape index: {}]   ;;  %s5833_s6 = inlined_call_operand.vmem [shape: f32[1,128], index: 6, kind: input, shape index: {}]   ;;  %s5834_s7 = inlined_call_operand.vmem [shape: bf16[128,128], index: 7, kind: input, shape index: {}]   ;;  %s5835_s4 = inlined_call_operand.vmem [shape: f32[1,512], index: 4, kind: input, shape index: {}]   ;;  %s5836_s8 = inlined_call_operand.vmem [shape: f32[1,128], index: 8, kind: input, shape index: {}]   ;;  %s5837_s9 = inlined_call_operand.vmem [shape: f32[8,128], index: 9, kind: output, shape index: {}]  }
   0x1   :  { %v293_v0 = vld [vmem:[%s5828_s1 + $0x10] sm:$0x3]  ;;  %v4318_v4 = vld [vmem:[%s5828_s1 + $0x8] sm:$0xff]  ;;  %v4317_v5 = vld [vmem:[%s5828_s1] sm:$0xff]  ;;  %vm2621_vm4 = vcmask 1043459   ;;  %vm2623_vm5 = vcmask 1044484  }
   0x2   :  { %v947_v1 = vunpack.c.l.b16 %v293_v0  ;;  %v4189_v6 = vld [vmem:[%s5830_s0] sm:$0xff]  ;;  %v4226_v7 = vld [vmem:[%s5830_s0 + $0x128] sm:$0xff]  ;;  %v4227_v11 = vld [vmem:[%s5830_s0 + $0x130] sm:$0xff]  ;;  %vm2625_vm6 = vcmask 1045509   ;;  %vm2627_vm7 = vcmask 1046534   ;;  %vm2629_vm8 = vcmask 1047559  }
   0x3   :  { %v4258_v8 = vld [vmem:[%s5830_s0 + $0x228] sm:$0xff]  ;;  %v4289_v9 = vld [vmem:[%s5830_s0 + $0x320] sm:$0xff]  ;;  %v4259_v12 = vld [vmem:[%s5830_s0 + $0x230] sm:$0xff] }
   0x4   :  { %v950_v2 = vpack.c.b16 %v947_v1, %v947_v1  ;;  %v4190_v10 = vld [vmem:[%s5830_s0 + $0x8] sm:$0xff]  ;;  %v4191_v14 = vld [vmem:[%s5830_s0 + $0x10] sm:$0xff]  ;;  %v4228_v15 = vld [vmem:[%s5830_s0 + $0x138] sm:$0xff] }
   0x5   :  { %v4290_v13 = vld [vmem:[%s5830_s0 + $0x328] sm:$0xff]  ;;  %v4260_v16 = vld [vmem:[%s5830_s0 + $0x238] sm:$0xff]  ;;  %v4291_v17 = vld [vmem:[%s5830_s0 + $0x330] sm:$0xff] }
   0x6   :  { %v1340_v3 = vsel %vm1338_vm0, %v950_v2, 0  ;;  %v4192_v18 = vld [vmem:[%s5830_s0 + $0x18] sm:$0xff]  ;;  %v4229_v19 = vld [vmem:[%s5830_s0 + $0x140] sm:$0xff]  ;;  %v4230_v23 = vld [vmem:[%s5830_s0 + $0x148] sm:$0xff] }
   0x7   :  { %1347 = vmatpush.bf16.msra.mxu0 %v1340_v3  ;;  %4391 = vmatpush.bf16.msra.mxu1 %v1340_v3  ;;  %v4261_v20 = vld [vmem:[%s5830_s0 + $0x240] sm:$0xff]  ;;  %v4292_v21 = vld [vmem:[%s5830_s0 + $0x338] sm:$0xff]  ;;  %v4262_v24 = vld [vmem:[%s5830_s0 + $0x248] sm:$0xff] }
   0x8   :  { %4392 = vmatpush.bf16.msra.mxu2 %v1340_v3  ;;  %4393 = vmatpush.bf16.msra.mxu3 %v1340_v3  ;;  %v4193_v22 = vld [vmem:[%s5830_s0 + $0x20] sm:$0xff]  ;;  %v4194_v26 = vld [vmem:[%s5830_s0 + $0x28] sm:$0xff]  ;;  %v4231_v27 = vld [vmem:[%s5830_s0 + $0x150] sm:$0xff] }
   0x9   :  { %v4293_v25 = vld [vmem:[%s5830_s0 + $0x340] sm:$0xff]  ;;  %v4263_v28 = vld [vmem:[%s5830_s0 + $0x250] sm:$0xff]  ;;  %v4294_v29 = vld [vmem:[%s5830_s0 + $0x348] sm:$0xff] }
   0xa   :  { %v4195_v30 = vld [vmem:[%s5830_s0 + $0x30] sm:$0xff]  ;;  %v4232_v31 = vld [vmem:[%s5830_s0 + $0x158] sm:$0xff]  ;;  %v4233_v35 = vld [vmem:[%s5830_s0 + $0x160] sm:$0xff] }
   0xb   :  { %1348 = vmatpush.bf16.msra.mxu0 %v4318_v4  ;;  %4394 = vmatpush.bf16.msra.mxu1 %v4318_v4  ;;  %v4264_v32 = vld [vmem:[%s5830_s0 + $0x258] sm:$0xff]  ;;  %v4295_v33 = vld [vmem:[%s5830_s0 + $0x350] sm:$0xff]  ;;  %v4265_v36 = vld [vmem:[%s5830_s0 + $0x260] sm:$0xff] }
   0xc   :  { %4395 = vmatpush.bf16.msra.mxu2 %v4318_v4  ;;  %4396 = vmatpush.bf16.msra.mxu3 %v4318_v4  ;;  %v4196_v34 = vld [vmem:[%s5830_s0 + $0x38] sm:$0xff]  ;;  %v4197_v38 = vld [vmem:[%s5830_s0 + $0x40] sm:$0xff]  ;;  %v4234_v39 = vld [vmem:[%s5830_s0 + $0x168] sm:$0xff] }
   0xd   :  { %v4296_v37 = vld [vmem:[%s5830_s0 + $0x358] sm:$0xff]  ;;  %v4266_v42 = vld [vmem:[%s5830_s0 + $0x268] sm:$0xff]  ;;  %v4297_v43 = vld [vmem:[%s5830_s0 + $0x360] sm:$0xff] }
   0xe   :  { %v4609_v44 = vld [vmem:[%s5829_s2] ss:$0 sm:$0xff]  ;;  %v4198_v56 = vld [vmem:[%s5830_s0 + $0x48] sm:$0xff]  ;;  %v4235_v57 = vld [vmem:[%s5830_s0 + $0x170] sm:$0xff] }
   0xf   :  { %1349 = vmatpush.bf16.msra.mxu0 %v4317_v5  ;;  %4397 = vmatpush.bf16.msra.mxu1 %v4317_v5  ;;  %v4267_v60 = vld [vmem:[%s5830_s0 + $0x270] sm:$0xff]  ;;  %v4298_v61 = vld [vmem:[%s5830_s0 + $0x368] sm:$0xff] }
  0x10   :  { %4398 = vmatpush.bf16.msra.mxu2 %v4317_v5  ;;  %4399 = vmatpush.bf16.msra.mxu3 %v4317_v5 }
  0x12   :  { %3773 = vmatmul.msk.bf16.vlgmr.msra.gmra.mxu0 %vm953_vm1, %v4189_v6  ;;  %3810 = vmatmul.msk.bf16.vlgmr.msra.gmra.mxu1 %vm953_vm1, %v4226_v7 }
  0x13   :  { %3842 = vmatmul.msk.bf16.vlgmr.msra.gmra.mxu2 %vm953_vm1, %v4258_v8  ;;  %3873 = vmatmul.msk.bf16.vlgmr.msra.gmra.mxu3 %vm953_vm1, %v4289_v9 }
  0x22   :  { %3774 = vmatmul.msk.bf16.gmra.mxu0 %vm953_vm1, %v4190_v10  ;;  %3811 = vmatmul.msk.bf16.gmra.mxu1 %vm953_vm1, %v4227_v11  ;;  %v4199_v10 = vld [vmem:[%s5830_s0 + $0x50] sm:$0xff]  ;;  %v4236_v11 = vld [vmem:[%s5830_s0 + $0x178] sm:$0xff] }
  0x23   :  { %3843 = vmatmul.msk.bf16.gmra.mxu2 %vm953_vm1, %v4259_v12  ;;  %3874 = vmatmul.msk.bf16.gmra.mxu3 %vm953_vm1, %v4290_v13 }
  0x32   :  { %3775 = vmatmul.msk.bf16.gmra.mxu0 %vm953_vm1, %v4191_v14  ;;  %3812 = vmatmul.msk.bf16.gmra.mxu1 %vm953_vm1, %v4228_v15  ;;  %v4268_v14 = vld [vmem:[%s5830_s0 + $0x278] sm:$0xff]  ;;  %v4299_v15 = vld [vmem:[%s5830_s0 + $0x370] sm:$0xff] }
  0x33   :  { %3844 = vmatmul.msk.bf16.gmra.mxu2 %vm953_vm1, %v4260_v16  ;;  %3875 = vmatmul.msk.bf16.gmra.mxu3 %vm953_vm1, %v4291_v17 }
  0x42   :  { %3776 = vmatmul.msk.bf16.gmra.mxu0 %vm953_vm1, %v4192_v18  ;;  %3813 = vmatmul.msk.bf16.gmra.mxu1 %vm953_vm1, %v4229_v19 }
  0x43   :  { %3845 = vmatmul.msk.bf16.gmra.mxu2 %vm953_vm1, %v4261_v20  ;;  %3876 = vmatmul.msk.bf16.gmra.mxu3 %vm953_vm1, %v4292_v21 }
  0x52   :  { %3777 = vmatmul.msk.bf16.gmra.mxu0 %vm953_vm1, %v4193_v22  ;;  %3814 = vmatmul.msk.bf16.gmra.mxu1 %vm953_vm1, %v4230_v23 }
  0x53   :  { %3846 = vmatmul.msk.bf16.gmra.mxu2 %vm953_vm1, %v4262_v24  ;;  %3877 = vmatmul.msk.bf16.gmra.mxu3 %vm953_vm1, %v4293_v25 }
  0x62   :  { %3778 = vmatmul.msk.bf16.gmra.mxu0 %vm953_vm1, %v4194_v26  ;;  %3815 = vmatmul.msk.bf16.gmra.mxu1 %vm953_vm1, %v4231_v27 }
  0x63   :  { %3847 = vmatmul.msk.bf16.gmra.mxu2 %vm953_vm1, %v4263_v28  ;;  %3878 = vmatmul.msk.bf16.gmra.mxu3 %vm953_vm1, %v4294_v29  ;;  %v4200_v28 = vld [vmem:[%s5830_s0 + $0x58] sm:$0xff]  ;;  %v4237_v29 = vld [vmem:[%s5830_s0 + $0x180] sm:$0xff] }
  0x72   :  { %3779 = vmatmul.msk.bf16.gmra.mxu0 %vm953_vm1, %v4195_v30  ;;  %3816 = vmatmul.msk.bf16.gmra.mxu1 %vm953_vm1, %v4232_v31 }
  0x73   :  { %3848 = vmatmul.msk.bf16.gmra.mxu2 %vm953_vm1, %v4264_v32  ;;  %3879 = vmatmul.msk.bf16.gmra.mxu3 %vm953_vm1, %v4295_v33  ;;  %v4269_v32 = vld [vmem:[%s5830_s0 + $0x280] sm:$0xff]  ;;  %v4300_v33 = vld [vmem:[%s5830_s0 + $0x378] sm:$0xff] }
  0x82   :  { %3780 = vmatmul.msk.bf16.gmra.mxu0 %vm953_vm1, %v4196_v34  ;;  %3817 = vmatmul.msk.bf16.gmra.mxu1 %vm953_vm1, %v4233_v35 }
  0x83   :  { %3849 = vmatmul.msk.bf16.gmra.mxu2 %vm953_vm1, %v4265_v36  ;;  %3880 = vmatmul.msk.bf16.gmra.mxu3 %vm953_vm1, %v4296_v37 }
  0x8f   :  { %v1351_v40 = vpop.f32.mrf.mxu0  ;;  %v4598_v41 = vpop.f32.mrf.mxu1 }
  0x90   :  { %5840 = vst [vmem:[#allocation2_spill] sm:$0xff] %v4598_v41  ;;  %v1352_v45 = vadd.f32 %v4609_v44, %v1351_v40 }
  0x92   :  { %3781 = vmatmul.msk.bf16.gmra.mxu0 %vm953_vm1, %v4197_v38  ;;  %3818 = vmatmul.msk.bf16.gmra.mxu1 %vm953_vm1, %v4234_v39  ;;  %v1991_v51 = vmax.f32 %v1352_v45, 0.0 }
  0x93   :  { %3850 = vmatmul.msk.bf16.gmra.mxu2 %vm953_vm1, %v4266_v42  ;;  %3881 = vmatmul.msk.bf16.gmra.mxu3 %vm953_vm1, %v4297_v43 }
  0x96   :  { %v4616_v46 = vpop.f32.mrf.mxu2  ;;  %v4618_v47 = vpop.f32.mrf.mxu3 }
  0x97   :  { %v1353_v48 = vpop.f32.mrf.mxu0  ;;  %v4620_v49 = vpop.f32.mrf.mxu1 }
  0x98   :  { %5841 = vst [vmem:[#allocation3_spill] sm:$0xff] %v4620_v49  ;;  %v1354_v50 = vadd.f32 %v4609_v44, %v1353_v48 }
  0x9a   :  { %v1992_v52 = vmax.f32 %v1354_v50, 0.0 }
  0x9c   :  { %v2247_v53 = vadd.f32 %v1992_v52, %v1991_v51  ;;  %v4201_v51 = vld [vmem:[%s5830_s0 + $0x60] sm:$0xff]  ;;  %v4238_v52 = vld [vmem:[%s5830_s0 + $0x188] sm:$0xff] }
  0x9e   :  { %v4623_v54 = vpop.f32.mrf.mxu2  ;;  %v4625_v55 = vpop.f32.mrf.mxu3 }
  0x9f   :  { %v1356_v58 = vpop.f32.mrf.mxu0  ;;  %v4633_v59 = vpop.f32.mrf.mxu1 }
  0xa0   :  { %5842 = vst [vmem:[#allocation4_spill] sm:$0xff] %v4633_v59  ;;  %v1357_v62 = vadd.f32 %v4609_v44, %v1356_v58  ;;  %v4301_v58 = vld [vmem:[%s5830_s0 + $0x380] sm:$0xff] }
  0xa2   :  { %v1993_v63 = vmax.f32 %v1357_v62, 0.0  ;;  %3782 = vmatmul.msk.bf16.gmra.mxu0 %vm953_vm1, %v4198_v56  ;;  %3819 = vmatmul.msk.bf16.gmra.mxu1 %vm953_vm1, %v4235_v57  ;;  %v4270_v57 = vld [vmem:[%s5830_s0 + $0x288] sm:$0xff] }
  0xa3   :  { %3851 = vmatmul.msk.bf16.gmra.mxu2 %vm953_vm1, %v4267_v60  ;;  %3882 = vmatmul.msk.bf16.gmra.mxu3 %vm953_vm1, %v4298_v61 }
  0xa4   :  { %v2248_v0 = vadd.f32 %v2247_v53, %v1993_v63 }
  0xa6   :  { %v4646_v1 = vpop.f32.mrf.mxu2  ;;  %v4648_v2 = vpop.f32.mrf.mxu3 }
  0xa7   :  { %v1358_v3 = vpop.f32.mrf.mxu0  ;;  %v4650_v4 = vpop.f32.mrf.mxu1 }
  0xa8   :  { %5843 = vst [vmem:[#allocation5_spill] sm:$0xff] %v4650_v4  ;;  %v1359_v5 = vadd.f32 %v4609_v44, %v1358_v3 }
  0xaa   :  { %v1994_v6 = vmax.f32 %v1359_v5, 0.0 }
  0xac   :  { %v2249_v7 = vadd.f32 %v2248_v0, %v1994_v6 }
  0xae   :  { %v4653_v8 = vpop.f32.mrf.mxu2  ;;  %v4655_v9 = vpop.f32.mrf.mxu3 }
  0xaf   :  { %v1361_v12 = vpop.f32.mrf.mxu0  ;;  %v4663_v13 = vpop.f32.mrf.mxu1 }
  0xb0   :  { %5844 = vst [vmem:[#allocation6_spill] sm:$0xff] %v4663_v13  ;;  %v1362_v16 = vadd.f32 %v4609_v44, %v1361_v12 }
  0xb2   :  { %v1995_v17 = vmax.f32 %v1362_v16, 0.0  ;;  %3783 = vmatmul.msk.bf16.gmra.mxu0 %vm953_vm1, %v4199_v10  ;;  %3820 = vmatmul.msk.bf16.gmra.mxu1 %vm953_vm1, %v4236_v11 }
  0xb3   :  { %3852 = vmatmul.msk.bf16.gmra.mxu2 %vm953_vm1, %v4268_v14  ;;  %3883 = vmatmul.msk.bf16.gmra.mxu3 %vm953_vm1, %v4299_v15  ;;  %v4202_v14 = vld [vmem:[%s5830_s0 + $0x68] sm:$0xff]  ;;  %v4239_v15 = vld [vmem:[%s5830_s0 + $0x190] sm:$0xff] }
  0xb4   :  { %v2250_v18 = vadd.f32 %v2249_v7, %v1995_v17 }
  0xb6   :  { %v4676_v19 = vpop.f32.mrf.mxu2  ;;  %v4678_v20 = vpop.f32.mrf.mxu3 }
  0xb7   :  { %v1363_v21 = vpop.f32.mrf.mxu0  ;;  %v4680_v22 = vpop.f32.mrf.mxu1 }
  0xb8   :  { %5845 = vst [vmem:[#allocation7_spill] sm:$0xff] %v4680_v22  ;;  %v1364_v23 = vadd.f32 %v4609_v44, %v1363_v21  ;;  %v4302_v21 = vld [vmem:[%s5830_s0 + $0x388] sm:$0xff] }
  0xba   :  { %v1996_v24 = vmax.f32 %v1364_v23, 0.0 }
  0xbc   :  { %v2251_v25 = vadd.f32 %v2250_v18, %v1996_v24  ;;  %v4271_v18 = vld [vmem:[%s5830_s0 + $0x290] sm:$0xff] }
  0xbe   :  { %v4683_v26 = vpop.f32.mrf.mxu2  ;;  %v4685_v27 = vpop.f32.mrf.mxu3 }
  0xbf   :  { %v1366_v30 = vpop.f32.mrf.mxu0  ;;  %v4693_v31 = vpop.f32.mrf.mxu1 }
  0xc0   :  { %5846 = vst [vmem:[#allocation8_spill] sm:$0xff] %v4693_v31  ;;  %v1367_v34 = vadd.f32 %v4609_v44, %v1366_v30 }
  0xc2   :  { %v1997_v35 = vmax.f32 %v1367_v34, 0.0  ;;  %3784 = vmatmul.msk.bf16.gmra.mxu0 %vm953_vm1, %v4200_v28  ;;  %3821 = vmatmul.msk.bf16.gmra.mxu1 %vm953_vm1, %v4237_v29 }
  0xc3   :  { %3853 = vmatmul.msk.bf16.gmra.mxu2 %vm953_vm1, %v4269_v32  ;;  %3884 = vmatmul.msk.bf16.gmra.mxu3 %vm953_vm1, %v4300_v33 }
  0xc4   :  { %v2252_v36 = vadd.f32 %v2251_v25, %v1997_v35 }
  0xc6   :  { %v4706_v37 = vpop.f32.mrf.mxu2  ;;  %v4708_v38 = vpop.f32.mrf.mxu3 }
  0xc7   :  { %v1368_v39 = vpop.f32.mrf.mxu0  ;;  %v4710_v40 = vpop.f32.mrf.mxu1 }
  0xc8   :  { %5847 = vst [vmem:[#allocation9_spill] sm:$0xff] %v4710_v40  ;;  %v1369_v42 = vadd.f32 %v4609_v44, %v1368_v39  ;;  %v3999_v40 = vld [vmem:[%s5831_s3 + $0xc0] sm:$0xf] }
  0xca   :  { %v1998_v43 = vmax.f32 %v1369_v42, 0.0  ;;  %v4203_v42 = vld [vmem:[%s5830_s0 + $0x70] sm:$0xff] }
  0xcc   :  { %v2253_v45 = vadd.f32 %v2252_v36, %v1998_v43  ;;  %v4240_v43 = vld [vmem:[%s5830_s0 + $0x198] sm:$0xff] }
  0xce   :  { %v4713_v48 = vpop.f32.mrf.mxu2  ;;  %v4715_v50 = vpop.f32.mrf.mxu3 }
  0xcf   :  { %v1371_v53 = vpop.f32.mrf.mxu0  ;;  %v4723_v56 = vpop.f32.mrf.mxu1 }
  0xd0   :  { %5848 = vst [vmem:[#allocation10_spill] sm:$0xff] %v4723_v56  ;;  %v1372_v60 = vadd.f32 %v4609_v44, %v1371_v53  ;;  %v4303_v53 = vld [vmem:[%s5830_s0 + $0x390] sm:$0xff] }
  0xd2   :  { %v1999_v61 = vmax.f32 %v1372_v60, 0.0  ;;  %3785 = vmatmul.msk.bf16.gmra.mxu0 %vm953_vm1, %v4201_v51  ;;  %3822 = vmatmul.msk.bf16.gmra.mxu1 %vm953_vm1, %v4238_v52  ;;  %v4272_v52 = vld [vmem:[%s5830_s0 + $0x298] sm:$0xff] }
  0xd3   :  { %3854 = vmatmul.msk.bf16.gmra.mxu2 %vm953_vm1, %v4270_v57  ;;  %3885 = vmatmul.msk.bf16.gmra.mxu3 %vm953_vm1, %v4301_v58 }
  0xd4   :  { %v2254_v62 = vadd.f32 %v2253_v45, %v1999_v61 }
  0xd6   :  { %v4736_v63 = vpop.f32.mrf.mxu2  ;;  %v4738_v0 = vpop.f32.mrf.mxu3 }
  0xd7   :  { %v1373_v3 = vpop.f32.mrf.mxu0  ;;  %v4740_v5 = vpop.f32.mrf.mxu1 }
  0xd8   :  { %5849 = vst [vmem:[#allocation11_spill] sm:$0xff] %v4740_v5  ;;  %v1374_v6 = vadd.f32 %v4609_v44, %v1373_v3 }
  0xda   :  { %v2000_v7 = vmax.f32 %v1374_v6, 0.0 }
  0xdc   :  { %v2255_v10 = vadd.f32 %v2254_v62, %v2000_v7 }
  0xde   :  { %v4743_v11 = vpop.f32.mrf.mxu2  ;;  %v4745_v12 = vpop.f32.mrf.mxu3 }
  0xdf   :  { %v1376_v16 = vpop.f32.mrf.mxu0  ;;  %v4753_v17 = vpop.f32.mrf.mxu1 }
  0xe0   :  { %5850 = vst [vmem:[#allocation12_spill] sm:$0xff] %v4753_v17  ;;  %v1377_v23 = vadd.f32 %v4609_v44, %v1376_v16 }
  0xe2   :  { %v2001_v24 = vmax.f32 %v1377_v23, 0.0  ;;  %3786 = vmatmul.msk.bf16.gmra.mxu0 %vm953_vm1, %v4202_v14  ;;  %3823 = vmatmul.msk.bf16.gmra.mxu1 %vm953_vm1, %v4239_v15 }
  0xe3   :  { %3855 = vmatmul.msk.bf16.gmra.mxu2 %vm953_vm1, %v4271_v18  ;;  %3886 = vmatmul.msk.bf16.gmra.mxu3 %vm953_vm1, %v4302_v21  ;;  %v4204_v18 = vld [vmem:[%s5830_s0 + $0x78] sm:$0xff]  ;;  %v4241_v21 = vld [vmem:[%s5830_s0 + $0x1a0] sm:$0xff] }
  0xe4   :  { %v2256_v25 = vadd.f32 %v2255_v10, %v2001_v24 }
  0xe6   :  { %v4766_v28 = vpop.f32.mrf.mxu2  ;;  %v4768_v29 = vpop.f32.mrf.mxu3 }
  0xe7   :  { %v1378_v30 = vpop.f32.mrf.mxu0  ;;  %v4770_v32 = vpop.f32.mrf.mxu1 }
  0xe8   :  { %5851 = vst [vmem:[#allocation13_spill] sm:$0xff] %v4770_v32  ;;  %v1379_v33 = vadd.f32 %v4609_v44, %v1378_v30  ;;  %v4304_v30 = vld [vmem:[%s5830_s0 + $0x398] sm:$0xff] }
  0xea   :  { %v2002_v34 = vmax.f32 %v1379_v33, 0.0 }
  0xec   :  { %v2257_v35 = vadd.f32 %v2256_v25, %v2002_v34  ;;  %v4273_v25 = vld [vmem:[%s5830_s0 + $0x2a0] sm:$0xff] }
  0xee   :  { %v4773_v36 = vpop.f32.mrf.mxu2  ;;  %v4775_v39 = vpop.f32.mrf.mxu3 }
  0xef   :  { %v1381_v45 = vpop.f32.mrf.mxu0  ;;  %v4783_v51 = vpop.f32.mrf.mxu1 }
  0xf0   :  { %5852 = vst [vmem:[#allocation14_spill] sm:$0xff] %v4783_v51  ;;  %v1382_v57 = vadd.f32 %v4609_v44, %v1381_v45 }
  0xf2   :  { %v2003_v58 = vmax.f32 %v1382_v57, 0.0  ;;  %3787 = vmatmul.msk.bf16.gmra.mxu0 %vm953_vm1, %v4203_v42  ;;  %3824 = vmatmul.msk.bf16.gmra.mxu1 %vm953_vm1, %v4240_v43  ;;  %v4015_v42 = vld [vmem:[%s5831_s3 + $0xe0] sm:$0xf]  ;;  %v4349_v43 = vld [vmem:[%s5831_s3 + $0xec] sm:$0xf0] }
  0xf3   :  { %3856 = vmatmul.msk.bf16.gmra.mxu2 %vm953_vm1, %v4272_v52  ;;  %3887 = vmatmul.msk.bf16.gmra.mxu3 %vm953_vm1, %v4303_v53  ;;  %v4016_v45 = vor.u32 %v4349_v43, %v4015_v42 }
  0xf4   :  { %v2258_v60 = vadd.f32 %v2257_v35, %v2003_v58 }
  0xf5   :  { %2793 = vmatpush.bf16.msrb.mxu1 %v4016_v45 }
  0xf6   :  { %v4796_v61 = vpop.f32.mrf.mxu2  ;;  %v4798_v62 = vpop.f32.mrf.mxu3 }
  0xf7   :  { %v1383_v3 = vpop.f32.mrf.mxu0  ;;  %v4800_v6 = vpop.f32.mrf.mxu1 }
  0xf8   :  { %5853 = vst [vmem:[#allocation15_spill] sm:$0xff] %v4800_v6  ;;  %v1384_v7 = vadd.f32 %v4609_v44, %v1383_v3 }
  0xfa   :  { %v2004_v10 = vmax.f32 %v1384_v7, 0.0 }
  0xfc   :  { %v2259_v14 = vadd.f32 %v2258_v60, %v2004_v10 }
  0xfe   :  { %v4803_v15 = vpop.f32.mrf.mxu2  ;;  %v4805_v16 = vpop.f32.mrf.mxu3 }
  0xff   :  { %v1386_v23 = vpop.f32.mrf.mxu0  ;;  %v4813_v24 = vpop.f32.mrf.mxu1 }
 0x100   :  { %5854 = vst [vmem:[#allocation16_spill] sm:$0xff] %v4813_v24  ;;  %v1387_v33 = vadd.f32 %v4609_v44, %v1386_v23 }
 0x102   :  { %v2005_v34 = vmax.f32 %v1387_v33, 0.0  ;;  %3788 = vmatmul.msk.bf16.gmra.mxu0 %vm953_vm1, %v4204_v18  ;;  %3825 = vmatmul.msk.bf16.gmra.mxu1 %vm953_vm1, %v4241_v21  ;;  %v4205_v18 = vld [vmem:[%s5830_s0 + $0x80] sm:$0xff]  ;;  %v4242_v21 = vld [vmem:[%s5830_s0 + $0x1a8] sm:$0xff] }
 0x103   :  { %3857 = vmatmul.msk.bf16.gmra.mxu2 %vm953_vm1, %v4273_v25  ;;  %3888 = vmatmul.msk.bf16.gmra.mxu3 %vm953_vm1, %v4304_v30  ;;  %v4274_v30 = vld [vmem:[%s5830_s0 + $0x2a8] sm:$0xff]  ;;  %v4305_v33 = vld [vmem:[%s5830_s0 + $0x3a0] sm:$0xff] }
 0x104   :  { %v2260_v35 = vadd.f32 %v2259_v14, %v2005_v34 }
 0x106   :  { %v4832_v52 = vpop.f32.mrf.mxu2  ;;  %v4834_v53 = vpop.f32.mrf.mxu3 }
 0x107   :  { %5855 = vst [vmem:[#allocation17_spill] sm:$0xff] %v4832_v52  ;;  %v1388_v57 = vpop.f32.mrf.mxu0  ;;  %v4836_v58 = vpop.f32.mrf.mxu1 }
 0x108   :  { %5856 = vst [vmem:[#allocation18_spill] sm:$0xff] %v4836_v58  ;;  %v1389_v60 = vadd.f32 %v4609_v44, %v1388_v57 }
 0x10a   :  { %v2006_v3 = vmax.f32 %v1389_v60, 0.0 }
 0x10c   :  { %v2261_v7 = vadd.f32 %v2260_v35, %v2006_v3 }
 0x10e   :  { %v4839_v10 = vpop.f32.mrf.mxu2  ;;  %v4841_v14 = vpop.f32.mrf.mxu3 }
 0x10f   :  { %5857 = vst [vmem:[#allocation19_spill] sm:$0xff] %v4839_v10  ;;  %v1391_v23 = vpop.f32.mrf.mxu0  ;;  %v4849_v25 = vpop.f32.mrf.mxu1 }
 0x110   :  { %5858 = vst [vmem:[#allocation20_spill] sm:$0xff] %v4849_v25  ;;  %v1392_v34 = vadd.f32 %v4609_v44, %v1391_v23 }
 0x112   :  { %v2007_v35 = vmax.f32 %v1392_v34, 0.0  ;;  %3789 = vmatmul.msk.bf16.gmra.mxu0 %vm953_vm1, %v4205_v18  ;;  %3826 = vmatmul.msk.bf16.gmra.mxu1 %vm953_vm1, %v4242_v21  ;;  %v4347_v18 = vld [vmem:[%s5831_s3 + $0xe4] sm:$0xf]  ;;  %v4017_v21 = vld [vmem:[%s5831_s3 + $0xf0] sm:$0xf0] }
 0x113   :  { %3858 = vmatmul.msk.bf16.gmra.mxu2 %vm953_vm1, %v4274_v30  ;;  %3889 = vmatmul.msk.bf16.gmra.mxu3 %vm953_vm1, %v4305_v33 }
 0x114   :  { %v2262_v42 = vadd.f32 %v2261_v7, %v2007_v35  ;;  %v4020_v7 = vor.u32 %v4347_v18, %v4017_v21  ;;  %v4206_v35 = vld [vmem:[%s5830_s0 + $0x88] sm:$0xff] }
 0x115   :  { %v4306_v18 = vld [vmem:[%s5830_s0 + $0x3a8] sm:$0xff] }
 0x116   :  { %v4862_v43 = vpop.f32.mrf.mxu2  ;;  %v4864_v45 = vpop.f32.mrf.mxu3  ;;  %2806 = vmatpush.bf16.msrb.mxu2 %v4020_v7 }
 0x117   :  { %5859 = vst [vmem:[#allocation21_spill] sm:$0xff] %v4862_v43  ;;  %v1393_v57 = vpop.f32.mrf.mxu0  ;;  %v4866_v60 = vpop.f32.mrf.mxu1 }
 0x118   :  { %5860 = vst [vmem:[#allocation22_spill] sm:$0xff] %v4866_v60  ;;  %v1394_v3 = vadd.f32 %v4609_v44, %v1393_v57 }
 0x11a   :  { %v2008_v23 = vmax.f32 %v1394_v3, 0.0 }
 0x11c   :  { %v2263_v34 = vadd.f32 %v2262_v42, %v2008_v23  ;;  %v4243_v42 = vld [vmem:[%s5830_s0 + $0x1b0] sm:$0xff] }
 0x11d   :  { %v4275_v23 = vld [vmem:[%s5830_s0 + $0x2b0] sm:$0xff] }
 0x11e   :  { %v4875_v30 = vpop.f32.mrf.mxu2  ;;  %v4877_v33 = vpop.f32.mrf.mxu3 }
 0x11f   :  { %5861 = vst [vmem:[#allocation23_spill] sm:$0xff] %v4875_v30  ;;  %v1396_v57 = vpop.f32.mrf.mxu0  ;;  %v4885_v3 = vpop.f32.mrf.mxu1 }
 0x120   :  { %5862 = vst [vmem:[#allocation24_spill] sm:$0xff] %v4885_v3  ;;  %v1397_v21 = vadd.f32 %v4609_v44, %v1396_v57 }
 0x122   :  { %v2009_v60 = vmax.f32 %v1397_v21, 0.0  ;;  %3790 = vmatmul.msk.bf16.gmra.mxu0 %vm953_vm1, %v4206_v35  ;;  %3827 = vmatmul.msk.bf16.gmra.mxu1 %vm953_vm1, %v4243_v42  ;;  %v4207_v42 = vld [vmem:[%s5830_s0 + $0x90] sm:$0xff] }
 0x123   :  { %3859 = vmatmul.msk.bf16.gmra.mxu2 %vm953_vm1, %v4275_v23  ;;  %3890 = vmatmul.msk.bf16.gmra.mxu3 %vm953_vm1, %v4306_v18 }
 0x124   :  { %v2264_v3 = vadd.f32 %v2263_v34, %v2009_v60  ;;  %v4244_v60 = vld [vmem:[%s5830_s0 + $0x1b8] sm:$0xff] }
 0x126   :  { %v4898_v25 = vpop.f32.mrf.mxu2  ;;  %v4900_v58 = vpop.f32.mrf.mxu3 }
 0x127   :  { %5863 = vst [vmem:[#allocation25_spill] sm:$0xff] %v4898_v25  ;;  %v1398_v24 = vpop.f32.mrf.mxu0  ;;  %v4902_v6 = vpop.f32.mrf.mxu1 }
 0x128   :  { %5864 = vst [vmem:[#allocation26_spill] sm:$0xff] %v4900_v58  ;;  %v1399_v7 = vadd.f32 %v4609_v44, %v1398_v24  ;;  %v4276_v24 = vld [vmem:[%s5830_s0 + $0x2b8] sm:$0xff] }
 0x129   :  { %5865 = vst [vmem:[#allocation27_spill] sm:$0xff] %v4902_v6 }
 0x12a   :  { %v2010_v57 = vmax.f32 %v1399_v7, 0.0 }
 0x12c   :  { %v2265_v21 = vadd.f32 %v2264_v3, %v2010_v57  ;;  %v4307_v3 = vld [vmem:[%s5830_s0 + $0x3b0] sm:$0xff] }
 0x12e   :  { %v4905_v51 = vpop.f32.mrf.mxu2  ;;  %v4907_v35 = vpop.f32.mrf.mxu3 }
 0x12f   :  { %5866 = vst [vmem:[#allocation28_spill] sm:$0xff] %v4905_v51  ;;  %v1401_v34 = vpop.f32.mrf.mxu0  ;;  %v4915_v23 = vpop.f32.mrf.mxu1 }
 0x130   :  { %5867 = vst [vmem:[#allocation29_spill] sm:$0xff] %v4907_v35  ;;  %v1402_v18 = vadd.f32 %v4609_v44, %v1401_v34 }
 0x131   :  { %5868 = vst [vmem:[#allocation30_spill] sm:$0xff] %v4915_v23 }
 0x132   :  { %v2011_v7 = vmax.f32 %v1402_v18, 0.0  ;;  %3791 = vmatmul.msk.bf16.gmra.mxu0 %vm953_vm1, %v4207_v42  ;;  %3828 = vmatmul.msk.bf16.gmra.mxu1 %vm953_vm1, %v4244_v60  ;;  %v4208_v60 = vld [vmem:[%s5830_s0 + $0x98] sm:$0xff] }
 0x133   :  { %3860 = vmatmul.msk.bf16.gmra.mxu2 %vm953_vm1, %v4276_v24  ;;  %3891 = vmatmul.msk.bf16.gmra.mxu3 %vm953_vm1, %v4307_v3 }
 0x134   :  { %v2266_v57 = vadd.f32 %v2265_v21, %v2011_v7  ;;  %v4245_v21 = vld [vmem:[%s5830_s0 + $0x1c0] sm:$0xff] }
 0x136   :  { %v4928_v23 = vpop.f32.mrf.mxu2  ;;  %v4930_v6 = vpop.f32.mrf.mxu3 }
 0x137   :  { %5869 = vst [vmem:[#allocation31_spill] sm:$0xff] %v4928_v23  ;;  %v1403_v32 = vpop.f32.mrf.mxu0  ;;  %v4932_v17 = vpop.f32.mrf.mxu1 }
 0x138   :  { %5870 = vst [vmem:[#allocation32_spill] sm:$0xff] %v4930_v6  ;;  %v1404_v5 = vadd.f32 %v4609_v44, %v1403_v32  ;;  %v4277_v32 = vld [vmem:[%s5830_s0 + $0x2c0] sm:$0xff] }
 0x139   :  { %5871 = vst [vmem:[#allocation33_spill] sm:$0xff] %v4932_v17 }
 0x13a   :  { %v2012_v34 = vmax.f32 %v1404_v5, 0.0  ;;  %v4308_v5 = vld [vmem:[%s5830_s0 + $0x3b8] sm:$0xff] }
 0x13c   :  { %v2267_v18 = vadd.f32 %v2266_v57, %v2012_v34 }
 0x13e   :  { %v4935_v56 = vpop.f32.mrf.mxu2  ;;  %v4937_v42 = vpop.f32.mrf.mxu3 }
 0x13f   :  { %5872 = vst [vmem:[#allocation34_spill] sm:$0xff] %v4935_v56  ;;  %v1406_v24 = vpop.f32.mrf.mxu0  ;;  %v1591_v3 = vpop.f32.mrf.mxu1 }
 0x140   :  { %5873 = vst [vmem:[#allocation35_spill] sm:$0xff] %v4937_v42  ;;  %v1407_v7 = vadd.f32 %v4609_v44, %v1406_v24  ;;  %v1592_v17 = vadd.f32 %v4609_v44, %v1591_v3  ;;  %v4345_v24 = vld [vmem:[%s5831_s3 + $0xcc] sm:$0xf0] }
 0x142   :  { %v2013_v57 = vmax.f32 %v1407_v7, 0.0  ;;  %3792 = vmatmul.msk.bf16.gmra.mxu0 %vm953_vm1, %v4208_v60  ;;  %3829 = vmatmul.msk.bf16.gmra.mxu1 %vm953_vm1, %v4245_v21  ;;  %v4000_v7 = vor.u32 %v4345_v24, %v3999_v40  ;;  %v4209_v40 = vld [vmem:[%s5830_s0 + $0xa0] sm:$0xff] }
 0x143   :  { %3861 = vmatmul.msk.bf16.gmra.mxu2 %vm953_vm1, %v4277_v32  ;;  %3892 = vmatmul.msk.bf16.gmra.mxu3 %vm953_vm1, %v4308_v5  ;;  %v2087_v32 = vmax.f32 %v1592_v17, 0.0  ;;  %v4246_v17 = vld [vmem:[%s5830_s0 + $0x1c8] sm:$0xff] }
 0x144   :  { %v2268_v34 = vadd.f32 %v2267_v18, %v2013_v57  ;;  %2794 = vmatpush.bf16.msrb.mxu1 %v4000_v7 }
 0x146   :  { %v1751_v31 = vpop.f32.mrf.mxu2  ;;  %v4963_v60 = vpop.f32.mrf.mxu3 }
 0x147   :  { %5874 = vst [vmem:[#allocation36_spill] sm:$0xff] %v4963_v60  ;;  %v1408_v21 = vpop.f32.mrf.mxu0  ;;  %v1593_v22 = vpop.f32.mrf.mxu1  ;;  %v1752_v13 = vadd.f32 %v4609_v44, %v1751_v31  ;;  %v4278_v31 = vld [vmem:[%s5830_s0 + $0x2c8] sm:$0xff] }
 0x148   :  { %v1409_v18 = vadd.f32 %v4609_v44, %v1408_v21  ;;  %v1594_v3 = vadd.f32 %v4609_v44, %v1593_v22 }
 0x149   :  { %v2151_v24 = vmax.f32 %v1752_v13, 0.0 }
 0x14a   :  { %v2014_v5 = vmax.f32 %v1409_v18, 0.0  ;;  %v2088_v57 = vmax.f32 %v1594_v3, 0.0 }
 0x14c   :  { %v2269_v4 = vadd.f32 %v2268_v34, %v2014_v5  ;;  %v2358_v59 = vadd.f32 %v2088_v57, %v2087_v32  ;;  %v4309_v34 = vld [vmem:[%s5830_s0 + $0x3c0] sm:$0xff] }
 0x14e   :  { %v1753_v49 = vpop.f32.mrf.mxu2  ;;  %v4968_v41 = vpop.f32.mrf.mxu3 }
 0x14f   :  { %5875 = vst [vmem:[#allocation37_spill] sm:$0xff] %v4968_v41  ;;  %v1754_v22 = vadd.f32 %v4609_v44, %v1753_v49  ;;  %v1411_v7 = vpop.f32.mrf.mxu0  ;;  %v1596_v21 = vpop.f32.mrf.mxu1 }
 0x150   :  { %v1412_v32 = vadd.f32 %v4609_v44, %v1411_v7  ;;  %v1597_v18 = vadd.f32 %v4609_v44, %v1596_v21  ;;  %v4023_v7 = vld [vmem:[%s5831_s3 + $0xe8] sm:$0xf] }
 0x151   :  { %v2152_v3 = vmax.f32 %v1754_v22, 0.0  ;;  %v4350_v22 = vld [vmem:[%s5831_s3 + $0xf4] sm:$0xf0] }
 0x152   :  { %v2015_v5 = vmax.f32 %v1412_v32, 0.0  ;;  %v2089_v57 = vmax.f32 %v1597_v18, 0.0  ;;  %3793 = vmatmul.msk.bf16.gmra.mxu0 %vm953_vm1, %v4209_v40  ;;  %3830 = vmatmul.msk.bf16.gmra.mxu1 %vm953_vm1, %v4246_v17  ;;  %v4024_v21 = vor.u32 %v4350_v22, %v4023_v7  ;;  %v4343_v7 = vld [vmem:[%s5831_s3 + $0xc4] sm:$0xf]  ;;  %v4001_v22 = vld [vmem:[%s5831_s3 + $0xd0] sm:$0xf0] }
 0x153   :  { %v2432_v49 = vadd.f32 %v2152_v3, %v2151_v24  ;;  %3862 = vmatmul.msk.bf16.gmra.mxu2 %vm953_vm1, %v4278_v31  ;;  %3893 = vmatmul.msk.bf16.gmra.mxu3 %vm953_vm1, %v4309_v34 }
 0x154   :  { %v2270_v13 = vadd.f32 %v2269_v4, %v2015_v5  ;;  %v2359_v56 = vadd.f32 %v2358_v59, %v2089_v57  ;;  %2819 = vmatpush.bf16.msrb.mxu3 %v4024_v21  ;;  %v4004_v21 = vor.u32 %v4343_v7, %v4001_v22 }
 0x156   :  { %v1756_v32 = vpop.f32.mrf.mxu2  ;;  %v1911_v40 = vpop.f32.mrf.mxu3  ;;  %2807 = vmatpush.bf16.msrb.mxu2 %v4004_v21 }
 0x157   :  { %v1757_v17 = vadd.f32 %v4609_v44, %v1756_v32  ;;  %v1413_v24 = vpop.f32.mrf.mxu0  ;;  %v1598_v18 = vpop.f32.mrf.mxu1  ;;  %v1912_v57 = vadd.f32 %v4609_v44, %v1911_v40 }
 0x158   :  { %v1414_v31 = vadd.f32 %v4609_v44, %v1413_v24  ;;  %v1599_v59 = vadd.f32 %v4609_v44, %v1598_v18 }
 0x159   :  { %v2153_v4 = vmax.f32 %v1757_v17, 0.0  ;;  %v4210_v17 = vld [vmem:[%s5830_s0 + $0xa8] sm:$0xff] }
 0x15a   :  { %v2016_v34 = vmax.f32 %v1414_v31, 0.0  ;;  %v2090_v3 = vmax.f32 %v1599_v59, 0.0  ;;  %v4279_v59 = vld [vmem:[%s5830_s0 + $0x2d0] sm:$0xff] }
 0x15b   :  { %v2433_v5 = vadd.f32 %v2432_v49, %v2153_v4  ;;  %v4247_v49 = vld [vmem:[%s5830_s0 + $0x1d0] sm:$0xff]  ;;  %v4310_v4 = vld [vmem:[%s5830_s0 + $0x3c8] sm:$0xff] }
 0x15c   :  { %v2271_v23 = vadd.f32 %v2270_v13, %v2016_v34  ;;  %v2360_v51 = vadd.f32 %v2359_v56, %v2090_v3  ;;  %v2215_v56 = vmax.f32 %v1912_v57, 0.0 }
 0x15e   :  { %v1758_v32 = vpop.f32.mrf.mxu2  ;;  %v1913_v24 = vpop.f32.mrf.mxu3 }
 0x15f   :  { %v1759_v13 = vadd.f32 %v4609_v44, %v1758_v32  ;;  %v1914_v40 = vadd.f32 %v4609_v44, %v1913_v24  ;;  %v1416_v18 = vpop.f32.mrf.mxu0  ;;  %v1601_v31 = vpop.f32.mrf.mxu1 }
 0x160   :  { %v1417_v34 = vadd.f32 %v4609_v44, %v1416_v18  ;;  %v1602_v3 = vadd.f32 %v4609_v44, %v1601_v31 }
 0x161   :  { %v2154_v57 = vmax.f32 %v1759_v13, 0.0  ;;  %v2216_v7 = vmax.f32 %v1914_v40, 0.0 }
 0x162   :  { %v2017_v22 = vmax.f32 %v1417_v34, 0.0  ;;  %v2091_v32 = vmax.f32 %v1602_v3, 0.0  ;;  %3794 = vmatmul.msk.bf16.gmra.mxu0 %vm953_vm1, %v4210_v17  ;;  %3831 = vmatmul.msk.bf16.gmra.mxu1 %vm953_vm1, %v4247_v49 }
 0x163   :  { %v2434_v24 = vadd.f32 %v2433_v5, %v2154_v57  ;;  %v2506_v41 = vadd.f32 %v2216_v7, %v2215_v56  ;;  %3863 = vmatmul.msk.bf16.gmra.mxu2 %vm953_vm1, %v4279_v59  ;;  %3894 = vmatmul.msk.bf16.gmra.mxu3 %vm953_vm1, %v4310_v4 }
 0x164   :  { %v2272_v25 = vadd.f32 %v2271_v23, %v2017_v22  ;;  %v2361_v21 = vadd.f32 %v2360_v51, %v2091_v32  ;;  %v4248_v32 = vld [vmem:[%s5830_s0 + $0x1d8] sm:$0xff] }
 0x166   :  { %v1761_v60 = vpop.f32.mrf.mxu2  ;;  %v1916_v18 = vpop.f32.mrf.mxu3 }
 0x167   :  { %v1762_v31 = vadd.f32 %v4609_v44, %v1761_v60  ;;  %v1917_v13 = vadd.f32 %v4609_v44, %v1916_v18  ;;  %v1418_v40 = vpop.f32.mrf.mxu0  ;;  %v1603_v34 = vpop.f32.mrf.mxu1  ;;  %v4211_v60 = vld [vmem:[%s5830_s0 + $0xb0] sm:$0xff] }
 0x168   :  { %v1419_v17 = vadd.f32 %v4609_v44, %v1418_v40  ;;  %v1604_v49 = vadd.f32 %v4609_v44, %v1603_v34 }
 0x169   :  { %v2155_v5 = vmax.f32 %v1762_v31, 0.0  ;;  %v2217_v56 = vmax.f32 %v1917_v13, 0.0 }
 0x16a   :  { %v2018_v3 = vmax.f32 %v1419_v17, 0.0  ;;  %v2092_v59 = vmax.f32 %v1604_v49, 0.0 }
 0x16b   :  { %v2435_v57 = vadd.f32 %v2434_v24, %v2155_v5  ;;  %v2507_v4 = vadd.f32 %v2506_v41, %v2217_v56  ;;  %v4280_v41 = vld [vmem:[%s5830_s0 + $0x2d8] sm:$0xff] }
 0x16c   :  { %v2273_v23 = vadd.f32 %v2272_v25, %v2018_v3  ;;  %v2362_v51 = vadd.f32 %v2361_v21, %v2092_v59  ;;  %v4311_v25 = vld [vmem:[%s5830_s0 + $0x3d0] sm:$0xff] }
 0x16e   :  { %v1763_v7 = vpop.f32.mrf.mxu2  ;;  %v1918_v22 = vpop.f32.mrf.mxu3 }
 0x16f   :  { %v1764_v18 = vadd.f32 %v4609_v44, %v1763_v7  ;;  %v1919_v31 = vadd.f32 %v4609_v44, %v1918_v22  ;;  %v1421_v13 = vpop.f32.mrf.mxu0  ;;  %v1606_v40 = vpop.f32.mrf.mxu1 }
 0x170   :  { %v1422_v24 = vadd.f32 %v4609_v44, %v1421_v13  ;;  %v1607_v21 = vadd.f32 %v4609_v44, %v1606_v40 }
 0x171   :  { %v2156_v34 = vmax.f32 %v1764_v18, 0.0  ;;  %v2218_v17 = vmax.f32 %v1919_v31, 0.0 }
 0x172   :  { %v2019_v49 = vmax.f32 %v1422_v24, 0.0  ;;  %v2093_v5 = vmax.f32 %v1607_v21, 0.0  ;;  %3795 = vmatmul.msk.bf16.gmra.mxu0 %vm953_vm1, %v4211_v60  ;;  %3832 = vmatmul.msk.bf16.gmra.mxu1 %vm953_vm1, %v4248_v32 }
 0x173   :  { %v2436_v56 = vadd.f32 %v2435_v57, %v2156_v34  ;;  %v2508_v3 = vadd.f32 %v2507_v4, %v2218_v17  ;;  %3864 = vmatmul.msk.bf16.gmra.mxu2 %vm953_vm1, %v4280_v41  ;;  %3895 = vmatmul.msk.bf16.gmra.mxu3 %vm953_vm1, %v4311_v25 }
 0x174   :  { %v2274_v59 = vadd.f32 %v2273_v23, %v2019_v49  ;;  %v2363_v7 = vadd.f32 %v2362_v51, %v2093_v5  ;;  %v4212_v5 = vld [vmem:[%s5830_s0 + $0xb8] sm:$0xff] }
 0x176   :  { %v1766_v22 = vpop.f32.mrf.mxu2  ;;  %v1921_v13 = vpop.f32.mrf.mxu3 }
 0x177   :  { %v1767_v40 = vadd.f32 %v4609_v44, %v1766_v22  ;;  %v1922_v18 = vadd.f32 %v4609_v44, %v1921_v13  ;;  %v1423_v31 = vpop.f32.mrf.mxu0  ;;  %v1608_v24 = vpop.f32.mrf.mxu1  ;;  %v4249_v22 = vld [vmem:[%s5830_s0 + $0x1e0] sm:$0xff] }
 0x178   :  { %v1424_v60 = vadd.f32 %v4609_v44, %v1423_v31  ;;  %v1609_v32 = vadd.f32 %v4609_v44, %v1608_v24 }
 0x179   :  { %v2157_v57 = vmax.f32 %v1767_v40, 0.0  ;;  %v2219_v4 = vmax.f32 %v1922_v18, 0.0 }
 0x17a   :  { %v2020_v21 = vmax.f32 %v1424_v60, 0.0  ;;  %v2094_v41 = vmax.f32 %v1609_v32, 0.0 }
 0x17b   :  { %v2437_v34 = vadd.f32 %v2436_v56, %v2157_v57  ;;  %v2509_v25 = vadd.f32 %v2508_v3, %v2219_v4  ;;  %v4281_v56 = vld [vmem:[%s5830_s0 + $0x2e0] sm:$0xff]  ;;  %v4312_v3 = vld [vmem:[%s5830_s0 + $0x3d8] sm:$0xff] }
 0x17c   :  { %v2275_v23 = vadd.f32 %v2274_v59, %v2020_v21  ;;  %v2364_v51 = vadd.f32 %v2363_v7, %v2094_v41 }
 0x17e   :  { %v1768_v17 = vpop.f32.mrf.mxu2  ;;  %v1923_v49 = vpop.f32.mrf.mxu3 }
 0x17f   :  { %v1769_v13 = vadd.f32 %v4609_v44, %v1768_v17  ;;  %v1924_v40 = vadd.f32 %v4609_v44, %v1923_v49  ;;  %v1426_v18 = vpop.f32.mrf.mxu0  ;;  %v1611_v31 = vpop.f32.mrf.mxu1  ;;  %v3983_v49 = vld [vmem:[%s5831_s3 + $0xa0] sm:$0xf] }
 0x180   :  { %v1427_v59 = vadd.f32 %v4609_v44, %v1426_v18  ;;  %v1612_v7 = vadd.f32 %v4609_v44, %v1611_v31 }
 0x181   :  { %v2158_v24 = vmax.f32 %v1769_v13, 0.0  ;;  %v2220_v60 = vmax.f32 %v1924_v40, 0.0  ;;  %v4341_v13 = vld [vmem:[%s5831_s3 + $0xac] sm:$0xf0] }
 0x182   :  { %v2021_v32 = vmax.f32 %v1427_v59, 0.0  ;;  %v2095_v57 = vmax.f32 %v1612_v7, 0.0  ;;  %3796 = vmatmul.msk.bf16.gmra.mxu0 %vm953_vm1, %v4212_v5  ;;  %3833 = vmatmul.msk.bf16.gmra.mxu1 %vm953_vm1, %v4249_v22  ;;  %v3984_v40 = vor.u32 %v4341_v13, %v3983_v49  ;;  %v4007_v49 = vld [vmem:[%s5831_s3 + $0xc8] sm:$0xf]  ;;  %v4346_v13 = vld [vmem:[%s5831_s3 + $0xd4] sm:$0xf0] }
 0x183   :  { %v2438_v4 = vadd.f32 %v2437_v34, %v2158_v24  ;;  %v2510_v21 = vadd.f32 %v2509_v25, %v2220_v60  ;;  %3865 = vmatmul.msk.bf16.gmra.mxu2 %vm953_vm1, %v4281_v56  ;;  %3896 = vmatmul.msk.bf16.gmra.mxu3 %vm953_vm1, %v4312_v3 }
 0x184   :  { %v2276_v41 = vadd.f32 %v2275_v23, %v2021_v32  ;;  %v2365_v17 = vadd.f32 %v2364_v51, %v2095_v57  ;;  %2795 = vmatpush.bf16.msrb.mxu1 %v3984_v40  ;;  %v4008_v40 = vor.u32 %v4346_v13, %v4007_v49 }
 0x186   :  { %v1771_v5 = vpop.f32.mrf.mxu2  ;;  %v1926_v18 = vpop.f32.mrf.mxu3  ;;  %2820 = vmatpush.bf16.msrb.mxu3 %v4008_v40 }
 0x187   :  { %v1772_v34 = vadd.f32 %v4609_v44, %v1771_v5  ;;  %v1927_v25 = vadd.f32 %v4609_v44, %v1926_v18  ;;  %v1428_v22 = vpop.f32.mrf.mxu0  ;;  %v1613_v31 = vpop.f32.mrf.mxu1 }
 0x188   :  { %v1429_v23 = vadd.f32 %v4609_v44, %v1428_v22  ;;  %v1614_v51 = vadd.f32 %v4609_v44, %v1613_v31  ;;  %v4282_v22 = vld [vmem:[%s5830_s0 + $0x2e8] sm:$0xff]  ;;  %v4313_v31 = vld [vmem:[%s5830_s0 + $0x3e0] sm:$0xff] }
 0x189   :  { %v2159_v56 = vmax.f32 %v1772_v34, 0.0  ;;  %v2221_v3 = vmax.f32 %v1927_v25, 0.0  ;;  %v4213_v34 = vld [vmem:[%s5830_s0 + $0xc0] sm:$0xff] }
 0x18a   :  { %v2022_v59 = vmax.f32 %v1429_v23, 0.0  ;;  %v2096_v7 = vmax.f32 %v1614_v51, 0.0 }
 0x18b   :  { %v2439_v24 = vadd.f32 %v2438_v4, %v2159_v56  ;;  %v2511_v60 = vadd.f32 %v2510_v21, %v2221_v3  ;;  %v4250_v4 = vld [vmem:[%s5830_s0 + $0x1e8] sm:$0xff] }
 0x18c   :  { %v5083_v32 = vadd.f32 %v2276_v41, %v2022_v59  ;;  %v2366_v57 = vadd.f32 %v2365_v17, %v2096_v7 }
 0x18e   :  { %v1773_v5 = vpop.f32.mrf.mxu2  ;;  %v1928_v18 = vpop.f32.mrf.mxu3 }
 0x18f   :  { %v1774_v21 = vadd.f32 %v4609_v44, %v1773_v5  ;;  %v1929_v41 = vadd.f32 %v4609_v44, %v1928_v18  ;;  %v1431_v17 = vpop.f32.mrf.mxu0  ;;  %v1616_v25 = vpop.f32.mrf.mxu1 }
 0x190   :  { %v1617_v23 = vadd.f32 %v4609_v44, %v1616_v25  ;;  %v1432_v13 = vadd.f32 %v4609_v44, %v1431_v17  ;;  %v4339_v17 = vld [vmem:[%s5831_s3 + $0xa4] sm:$0xf] }
 0x191   :  { %v2160_v51 = vmax.f32 %v1774_v21, 0.0  ;;  %v2222_v56 = vmax.f32 %v1929_v41, 0.0 }
 0x192   :  { %v2097_v3 = vmax.f32 %v1617_v23, 0.0  ;;  %3797 = vmatmul.msk.bf16.gmra.mxu0 %vm953_vm1, %v4213_v34  ;;  %3834 = vmatmul.msk.bf16.gmra.mxu1 %vm953_vm1, %v4250_v4 }
 0x193   :  { %v2440_v59 = vadd.f32 %v2439_v24, %v2160_v51  ;;  %v2512_v7 = vadd.f32 %v2511_v60, %v2222_v56  ;;  %3866 = vmatmul.msk.bf16.gmra.mxu2 %vm953_vm1, %v4282_v22  ;;  %3897 = vmatmul.msk.bf16.gmra.mxu3 %vm953_vm1, %v4313_v31  ;;  %v2023_v22 = vmax.f32 %v1432_v13, 0.0  ;;  %v3985_v56 = vld [vmem:[%s5831_s3 + $0xb0] sm:$0xf0]  ;;  %v4214_v13 = vld [vmem:[%s5830_s0 + $0xc8] sm:$0xff] }
 0x194   :  { %v2367_v49 = vadd.f32 %v2366_v57, %v2097_v3 }
 0x196   :  { %v1776_v5 = vpop.f32.mrf.mxu2  ;;  %v1931_v40 = vpop.f32.mrf.mxu3 }
 0x197   :  { %v1777_v18 = vadd.f32 %v4609_v44, %v1776_v5  ;;  %v1932_v21 = vadd.f32 %v4609_v44, %v1931_v40  ;;  %v1433_v41 = vpop.f32.mrf.mxu0  ;;  %v1618_v25 = vpop.f32.mrf.mxu1  ;;  %v3988_v40 = vor.u32 %v4339_v17, %v3985_v56 }
 0x198   :  { %v1434_v34 = vadd.f32 %v4609_v44, %v1433_v41  ;;  %v1619_v24 = vadd.f32 %v4609_v44, %v1618_v25 }
 0x199   :  { %v2161_v60 = vmax.f32 %v1777_v18, 0.0  ;;  %v2223_v4 = vmax.f32 %v1932_v21, 0.0  ;;  %2808 = vmatpush.bf16.msrb.mxu2 %v3988_v40 }
 0x19a   :  { %v2024_v23 = vmax.f32 %v1434_v34, 0.0  ;;  %v2098_v31 = vmax.f32 %v1619_v24, 0.0  ;;  %v4314_v24 = vld [vmem:[%s5830_s0 + $0x3e8] sm:$0xff] }
 0x19b   :  { %v2441_v57 = vadd.f32 %v2440_v59, %v2161_v60  ;;  %v2513_v51 = vadd.f32 %v2512_v7, %v2223_v4  ;;  %v4251_v59 = vld [vmem:[%s5830_s0 + $0x1f0] sm:$0xff] }
 0x19c   :  { %v2284_v3 = vadd.f32 %v2024_v23, %v2023_v22  ;;  %v2368_v5 = vadd.f32 %v2367_v49, %v2098_v31  ;;  %v4283_v49 = vld [vmem:[%s5830_s0 + $0x2f0] sm:$0xff] }
 0x19e   :  { %v1778_v41 = vpop.f32.mrf.mxu2  ;;  %v1933_v25 = vpop.f32.mrf.mxu3 }
 0x19f   :  { %v1779_v7 = vadd.f32 %v4609_v44, %v1778_v41  ;;  %v1934_v18 = vadd.f32 %v4609_v44, %v1933_v25  ;;  %v1436_v21 = vpop.f32.mrf.mxu0  ;;  %v1621_v34 = vpop.f32.mrf.mxu1 }
 0x1a0   :  { %v1437_v60 = vadd.f32 %v4609_v44, %v1436_v21  ;;  %v1622_v4 = vadd.f32 %v4609_v44, %v1621_v34  ;;  %v5144_v44 = vld [vmem:[%s5829_s2] ss:$0 sm:$0xff] }
 0x1a1   :  { %v2162_v22 = vmax.f32 %v1779_v7, 0.0  ;;  %v2224_v56 = vmax.f32 %v1934_v18, 0.0 }
 0x1a2   :  { %v2025_v23 = vmax.f32 %v1437_v60, 0.0  ;;  %v2099_v31 = vmax.f32 %v1622_v4, 0.0  ;;  %3798 = vmatmul.msk.bf16.gmra.mxu0 %vm953_vm1, %v4214_v13  ;;  %3835 = vmatmul.msk.bf16.gmra.mxu1 %vm953_vm1, %v4251_v59 }
 0x1a3   :  { %v2442_v17 = vadd.f32 %v2441_v57, %v2162_v22  ;;  %3867 = vmatmul.msk.bf16.gmra.mxu2 %vm953_vm1, %v4283_v49  ;;  %3898 = vmatmul.msk.bf16.gmra.mxu3 %vm953_vm1, %v4314_v24  ;;  %v2514_v21 = vadd.f32 %v2513_v51, %v2224_v56  ;;  %v4252_v56 = vld [vmem:[%s5830_s0 + $0x1f8] sm:$0xff] }
 0x1a4   :  { %v2285_v40 = vadd.f32 %v2284_v3, %v2025_v23  ;;  %v2369_v41 = vadd.f32 %v2368_v5, %v2099_v31 }
 0x1a6   :  { %v1781_v25 = vpop.f32.mrf.mxu2  ;;  %v1936_v30 = vpop.f32.mrf.mxu3 }
 0x1a7   :  { %v1782_v13 = vadd.f32 %v5144_v44, %v1781_v25  ;;  %v1937_v59 = vadd.f32 %v5144_v44, %v1936_v30  ;;  %v1438_v57 = vpop.f32.mrf.mxu0  ;;  %v1623_v7 = vpop.f32.mrf.mxu1  ;;  %v4215_v30 = vld [vmem:[%s5830_s0 + $0xd0] sm:$0xff] }
 0x1a8   :  { %v1439_v18 = vadd.f32 %v5144_v44, %v1438_v57  ;;  %v1624_v34 = vadd.f32 %v5144_v44, %v1623_v7 }
 0x1a9   :  { %v2163_v3 = vmax.f32 %v1782_v13, 0.0  ;;  %v2225_v5 = vmax.f32 %v1937_v59, 0.0 }
 0x1aa   :  { %v2026_v49 = vmax.f32 %v1439_v18, 0.0  ;;  %v2100_v24 = vmax.f32 %v1624_v34, 0.0 }
 0x1ab   :  { %v2443_v51 = vadd.f32 %v2442_v17, %v2163_v3  ;;  %v2515_v60 = vadd.f32 %v2514_v21, %v2225_v5  ;;  %v4284_v17 = vld [vmem:[%s5830_s0 + $0x2f8] sm:$0xff] }
 0x1ac   :  { %v2286_v4 = vadd.f32 %v2285_v40, %v2026_v49  ;;  %v2370_v22 = vadd.f32 %v2369_v41, %v2100_v24  ;;  %v4315_v40 = vld [vmem:[%s5830_s0 + $0x3f0] sm:$0xff] }
 0x1ae   :  { %v1783_v23 = vpop.f32.mrf.mxu2  ;;  %v1938_v31 = vpop.f32.mrf.mxu3 }
 0x1af   :  { %v1784_v25 = vadd.f32 %v5144_v44, %v1783_v23  ;;  %v1939_v13 = vadd.f32 %v5144_v44, %v1938_v31  ;;  %v1441_v59 = vpop.f32.mrf.mxu0  ;;  %v1626_v57 = vpop.f32.mrf.mxu1 }
 0x1b0   :  { %v1442_v41 = vadd.f32 %v5144_v44, %v1441_v59  ;;  %v1627_v21 = vadd.f32 %v5144_v44, %v1626_v57 }
 0x1b1   :  { %v2164_v7 = vmax.f32 %v1784_v25, 0.0  ;;  %v2226_v5 = vmax.f32 %v1939_v13, 0.0 }
 0x1b2   :  { %v2027_v18 = vmax.f32 %v1442_v41, 0.0  ;;  %v2101_v34 = vmax.f32 %v1627_v21, 0.0  ;;  %3799 = vmatmul.msk.bf16.gmra.mxu0 %vm953_vm1, %v4215_v30  ;;  %3836 = vmatmul.msk.bf16.gmra.mxu1 %vm953_vm1, %v4252_v56 }
 0x1b3   :  { %v2444_v3 = vadd.f32 %v2443_v51, %v2164_v7  ;;  %3868 = vmatmul.msk.bf16.gmra.mxu2 %vm953_vm1, %v4284_v17  ;;  %3899 = vmatmul.msk.bf16.gmra.mxu3 %vm953_vm1, %v4315_v40  ;;  %v2516_v59 = vadd.f32 %v2515_v60, %v2226_v5  ;;  %v4216_v5 = vld [vmem:[%s5830_s0 + $0xd8] sm:$0xff] }
 0x1b4   :  { %v2287_v49 = vadd.f32 %v2286_v4, %v2027_v18  ;;  %v2371_v24 = vadd.f32 %v2370_v22, %v2101_v34 }
 0x1b6   :  { %v1786_v23 = vpop.f32.mrf.mxu2  ;;  %v1941_v31 = vpop.f32.mrf.mxu3 }
 0x1b7   :  { %v1787_v57 = vadd.f32 %v5144_v44, %v1786_v23  ;;  %v1942_v25 = vadd.f32 %v5144_v44, %v1941_v31  ;;  %v1443_v41 = vpop.f32.mrf.mxu0  ;;  %v1628_v21 = vpop.f32.mrf.mxu1  ;;  %v4253_v23 = vld [vmem:[%s5830_s0 + $0x200] sm:$0xff] }
 0x1b8   :  { %v1444_v30 = vadd.f32 %v5144_v44, %v1443_v41  ;;  %v1629_v51 = vadd.f32 %v5144_v44, %v1628_v21 }
 0x1b9   :  { %v2165_v56 = vmax.f32 %v1787_v57, 0.0  ;;  %v2227_v13 = vmax.f32 %v1942_v25, 0.0 }
 0x1ba   :  { %v2028_v17 = vmax.f32 %v1444_v30, 0.0  ;;  %v2102_v7 = vmax.f32 %v1629_v51, 0.0 }
 0x1bb   :  { %v2445_v40 = vadd.f32 %v2444_v3, %v2165_v56  ;;  %v2517_v4 = vadd.f32 %v2516_v59, %v2227_v13  ;;  %v4285_v3 = vld [vmem:[%s5830_s0 + $0x300] sm:$0xff] }
 0x1bc   :  { %v2288_v22 = vadd.f32 %v2287_v49, %v2028_v17  ;;  %v2372_v18 = vadd.f32 %v2371_v24, %v2102_v7  ;;  %v4316_v49 = vld [vmem:[%s5830_s0 + $0x3f8] sm:$0xff] }
 0x1be   :  { %v1788_v34 = vpop.f32.mrf.mxu2  ;;  %v1943_v60 = vpop.f32.mrf.mxu3 }
 0x1bf   :  { %v1789_v31 = vadd.f32 %v5144_v44, %v1788_v34  ;;  %v1944_v57 = vadd.f32 %v5144_v44, %v1943_v60  ;;  %v1446_v25 = vpop.f32.mrf.mxu0  ;;  %v1631_v41 = vpop.f32.mrf.mxu1  ;;  %v3991_v34 = vld [vmem:[%s5831_s3 + $0xa8] sm:$0xf]  ;;  %v4342_v60 = vld [vmem:[%s5831_s3 + $0xb4] sm:$0xf0] }
 0x1c0   :  { %v1447_v24 = vadd.f32 %v5144_v44, %v1446_v25  ;;  %v1632_v59 = vadd.f32 %v5144_v44, %v1631_v41 }
 0x1c1   :  { %v2166_v21 = vmax.f32 %v1789_v31, 0.0  ;;  %v2228_v13 = vmax.f32 %v1944_v57, 0.0 }
 0x1c2   :  { %v2029_v30 = vmax.f32 %v1447_v24, 0.0  ;;  %v2103_v51 = vmax.f32 %v1632_v59, 0.0  ;;  %3800 = vmatmul.msk.bf16.gmra.mxu0 %vm953_vm1, %v4216_v5  ;;  %3837 = vmatmul.msk.bf16.gmra.mxu1 %vm953_vm1, %v4253_v23  ;;  %v3967_v5 = vld [vmem:[%s5831_s3 + $0x80] sm:$0xf]  ;;  %v4337_v23 = vld [vmem:[%s5831_s3 + $0x8c] sm:$0xf0] }
 0x1c3   :  { %v2446_v56 = vadd.f32 %v2445_v40, %v2166_v21  ;;  %3869 = vmatmul.msk.bf16.gmra.mxu2 %vm953_vm1, %v4285_v3  ;;  %3900 = vmatmul.msk.bf16.gmra.mxu3 %vm953_vm1, %v4316_v49  ;;  %v3992_v40 = vor.u32 %v4342_v60, %v3991_v34  ;;  %v2518_v57 = vadd.f32 %v2517_v4, %v2228_v13 }
 0x1c4   :  { %v2289_v17 = vadd.f32 %v2288_v22, %v2029_v30  ;;  %v2373_v7 = vadd.f32 %v2372_v18, %v2103_v51  ;;  %v3968_v18 = vor.u32 %v4337_v23, %v3967_v5 }
 0x1c5   :  { %2821 = vmatpush.bf16.msrb.mxu3 %v3992_v40  ;;  %v4254_v40 = vld [vmem:[%s5830_s0 + $0x208] sm:$0xff] }
 0x1c6   :  { %v1791_v31 = vpop.f32.mrf.mxu2  ;;  %v1946_v22 = vpop.f32.mrf.mxu3  ;;  %2796 = vmatpush.bf16.msrb.mxu1 %v3968_v18 }
 0x1c7   :  { %v1792_v25 = vadd.f32 %v5144_v44, %v1791_v31  ;;  %v1947_v41 = vadd.f32 %v5144_v44, %v1946_v22  ;;  %v1448_v3 = vpop.f32.mrf.mxu0  ;;  %v1633_v49 = vpop.f32.mrf.mxu1  ;;  %v4217_v31 = vld [vmem:[%s5830_s0 + $0xe0] sm:$0xff] }
 0x1c8   :  { %v1449_v24 = vadd.f32 %v5144_v44, %v1448_v3  ;;  %v1634_v59 = vadd.f32 %v5144_v44, %v1633_v49 }
 0x1c9   :  { %v2167_v21 = vmax.f32 %v1792_v25, 0.0  ;;  %v2229_v30 = vmax.f32 %v1947_v41, 0.0 }
 0x1ca   :  { %v2030_v51 = vmax.f32 %v1449_v24, 0.0  ;;  %v2104_v34 = vmax.f32 %v1634_v59, 0.0 }
 0x1cb   :  { %v2447_v60 = vadd.f32 %v2446_v56, %v2167_v21  ;;  %v2519_v42 = vadd.f32 %v2518_v57, %v2229_v30  ;;  %v4286_v56 = vld [vmem:[%s5830_s0 + $0x308] sm:$0xff]  ;;  %v4335_v30 = vld [vmem:[%s5831_s3 + $0x84] sm:$0xf] }
 0x1cc   :  { %v2290_v5 = vadd.f32 %v2289_v17, %v2030_v51  ;;  %v2374_v4 = vadd.f32 %v2373_v7, %v2104_v34  ;;  %v3969_v51 = vld [vmem:[%s5831_s3 + $0x90] sm:$0xf0] }
 0x1ce   :  { %v1793_v13 = vpop.f32.mrf.mxu2  ;;  %v1948_v23 = vpop.f32.mrf.mxu3 }
 0x1cf   :  { %v1949_v22 = vadd.f32 %v5144_v44, %v1948_v23  ;;  %v1451_v18 = vpop.f32.mrf.mxu0  ;;  %v1636_v25 = vpop.f32.mrf.mxu1  ;;  %v1794_v57 = vadd.f32 %v5144_v44, %v1793_v13  ;;  %v3972_v13 = vor.u32 %v4335_v30, %v3969_v51 }
 0x1d0   :  { %v1452_v17 = vadd.f32 %v5144_v44, %v1451_v18  ;;  %v1637_v7 = vadd.f32 %v5144_v44, %v1636_v25 }
 0x1d1   :  { %v2230_v41 = vmax.f32 %v1949_v22, 0.0  ;;  %v2168_v34 = vmax.f32 %v1794_v57, 0.0  ;;  %2809 = vmatpush.bf16.msrb.mxu2 %v3972_v13  ;;  %v4255_v13 = vld [vmem:[%s5830_s0 + $0x210] sm:$0xff] }
 0x1d2   :  { %v2031_v3 = vmax.f32 %v1452_v17, 0.0  ;;  %v2105_v49 = vmax.f32 %v1637_v7, 0.0  ;;  %3801 = vmatmul.msk.bf16.gmra.mxu0 %vm953_vm1, %v4217_v31  ;;  %3838 = vmatmul.msk.bf16.gmra.mxu1 %vm953_vm1, %v4254_v40 }
 0x1d3   :  { %v2520_v24 = vadd.f32 %v2519_v42, %v2230_v41  ;;  %3870 = vmatmul.msk.bf16.gmra.mxu2 %vm953_vm1, %v4286_v56 }
 0x1d4   :  { %v2291_v59 = vadd.f32 %v2290_v5, %v2031_v3  ;;  %v2375_v21 = vadd.f32 %v2374_v4, %v2105_v49  ;;  %v2448_v4 = vadd.f32 %v2447_v60, %v2168_v34 }
 0x1d6   :  { %v1796_v23 = vpop.f32.mrf.mxu2  ;;  %v1951_v22 = vpop.f32.mrf.mxu3 }
 0x1d7   :  { %v1797_v31 = vadd.f32 %v5144_v44, %v1796_v23  ;;  %v1952_v42 = vadd.f32 %v5144_v44, %v1951_v22  ;;  %v1453_v40 = vpop.f32.mrf.mxu0  ;;  %v1638_v18 = vpop.f32.mrf.mxu1  ;;  %v4218_v23 = vld [vmem:[%s5830_s0 + $0xe8] sm:$0xff] }
 0x1d8   :  { %v1454_v5 = vadd.f32 %v5144_v44, %v1453_v40  ;;  %v1639_v7 = vadd.f32 %v5144_v44, %v1638_v18 }
 0x1d9   :  { %v2169_v25 = vmax.f32 %v1797_v31, 0.0  ;;  %v2231_v56 = vmax.f32 %v1952_v42, 0.0 }
 0x1da   :  { %v2032_v17 = vmax.f32 %v1454_v5, 0.0  ;;  %v2106_v49 = vmax.f32 %v1639_v7, 0.0 }
 0x1db   :  { %v2449_v41 = vadd.f32 %v2448_v4, %v2169_v25  ;;  %v2521_v57 = vadd.f32 %v2520_v24, %v2231_v56  ;;  %v4287_v24 = vld [vmem:[%s5830_s0 + $0x310] sm:$0xff] }
 0x1dc   :  { %v2292_v3 = vadd.f32 %v2291_v59, %v2032_v17  ;;  %v2376_v18 = vadd.f32 %v2375_v21, %v2106_v49 }
 0x1de   :  { %v1798_v30 = vpop.f32.mrf.mxu2  ;;  %v1953_v51 = vpop.f32.mrf.mxu3 }
 0x1df   :  { %v1954_v60 = vadd.f32 %v5144_v44, %v1953_v51  ;;  %v1456_v34 = vpop.f32.mrf.mxu0  ;;  %v1641_v22 = vpop.f32.mrf.mxu1  ;;  %v1799_v42 = vadd.f32 %v5144_v44, %v1798_v30 }
 0x1e0   :  { %v1457_v59 = vadd.f32 %v5144_v44, %v1456_v34  ;;  %v1642_v31 = vadd.f32 %v5144_v44, %v1641_v22 }
 0x1e1   :  { %v2232_v40 = vmax.f32 %v1954_v60, 0.0  ;;  %v2170_v7 = vmax.f32 %v1799_v42, 0.0 }
 0x1e2   :  { %v2033_v5 = vmax.f32 %v1457_v59, 0.0  ;;  %v2107_v4 = vmax.f32 %v1642_v31, 0.0  ;;  %3802 = vmatmul.msk.bf16.gmra.mxu0 %vm953_vm1, %v4218_v23  ;;  %3839 = vmatmul.msk.bf16.gmra.mxu1 %vm953_vm1, %v4255_v13 }
 0x1e3   :  { %v2522_v25 = vadd.f32 %v2521_v57, %v2232_v40  ;;  %3871 = vmatmul.msk.bf16.gmra.mxu2 %vm953_vm1, %v4287_v24  ;;  %v2450_v59 = vadd.f32 %v2449_v41, %v2170_v7 }
 0x1e4   :  { %v2293_v56 = vadd.f32 %v2292_v3, %v2033_v5  ;;  %v2377_v17 = vadd.f32 %v2376_v18, %v2107_v4  ;;  %v4219_v4 = vld [vmem:[%s5830_s0 + $0xf0] sm:$0xff] }
 0x1e6   :  { %v1801_v51 = vpop.f32.mrf.mxu2  ;;  %v1956_v34 = vpop.f32.mrf.mxu3 }
 0x1e7   :  { %v1802_v22 = vadd.f32 %v5144_v44, %v1801_v51  ;;  %v1957_v30 = vadd.f32 %v5144_v44, %v1956_v34  ;;  %v1458_v60 = vpop.f32.mrf.mxu0  ;;  %v1643_v21 = vpop.f32.mrf.mxu1  ;;  %v4256_v51 = vld [vmem:[%s5830_s0 + $0x218] sm:$0xff] }
 0x1e8   :  { %v1459_v49 = vadd.f32 %v5144_v44, %v1458_v60  ;;  %v1644_v57 = vadd.f32 %v5144_v44, %v1643_v21 }
 0x1e9   :  { %v2171_v23 = vmax.f32 %v1802_v22, 0.0  ;;  %v2233_v31 = vmax.f32 %v1957_v30, 0.0 }
 0x1ea   :  { %v2034_v13 = vmax.f32 %v1459_v49, 0.0  ;;  %v2108_v42 = vmax.f32 %v1644_v57, 0.0 }
 0x1eb   :  { %v2451_v24 = vadd.f32 %v2450_v59, %v2171_v23  ;;  %v2523_v3 = vadd.f32 %v2522_v25, %v2233_v31  ;;  %v4288_v25 = vld [vmem:[%s5830_s0 + $0x318] sm:$0xff] }
 0x1ec   :  { %v2294_v40 = vadd.f32 %v2293_v56, %v2034_v13  ;;  %v2378_v21 = vadd.f32 %v2377_v17, %v2108_v42 }
 0x1ee   :  { %v1803_v18 = vpop.f32.mrf.mxu2  ;;  %v1958_v5 = vpop.f32.mrf.mxu3 }
 0x1ef   :  { %v1959_v41 = vadd.f32 %v5144_v44, %v1958_v5  ;;  %v1461_v7 = vpop.f32.mrf.mxu0  ;;  %v1646_v34 = vpop.f32.mrf.mxu1  ;;  %v1804_v30 = vadd.f32 %v5144_v44, %v1803_v18 }
 0x1f0   :  { %v1462_v56 = vadd.f32 %v5144_v44, %v1461_v7  ;;  %v1647_v22 = vadd.f32 %v5144_v44, %v1646_v34 }
 0x1f1   :  { %v2234_v60 = vmax.f32 %v1959_v41, 0.0  ;;  %v2172_v57 = vmax.f32 %v1804_v30, 0.0 }
 0x1f2   :  { %v2035_v49 = vmax.f32 %v1462_v56, 0.0  ;;  %v2109_v59 = vmax.f32 %v1647_v22, 0.0  ;;  %3803 = vmatmul.msk.bf16.gmra.mxu0 %vm953_vm1, %v4219_v4  ;;  %3840 = vmatmul.msk.bf16.gmra.mxu1 %vm953_vm1, %v4256_v51 }
 0x1f3   :  { %v2524_v23 = vadd.f32 %v2523_v3, %v2234_v60  ;;  %3872 = vmatmul.msk.bf16.gmra.mxu2 %vm953_vm1, %v4288_v25  ;;  %v2452_v56 = vadd.f32 %v2451_v24, %v2172_v57  ;;  %v3975_v60 = vld [vmem:[%s5831_s3 + $0x88] sm:$0xf]  ;;  %v4220_v57 = vld [vmem:[%s5830_s0 + $0xf8] sm:$0xff] }
 0x1f4   :  { %v2295_v31 = vadd.f32 %v2294_v40, %v2035_v49  ;;  %v2379_v13 = vadd.f32 %v2378_v21, %v2109_v59  ;;  %v4338_v21 = vld [vmem:[%s5831_s3 + $0x94] sm:$0xf0] }
 0x1f5   :  { %v3976_v49 = vor.u32 %v4338_v21, %v3975_v60  ;;  %v4333_v60 = vld [vmem:[%s5831_s3 + $0x6c] sm:$0xf0] }
 0x1f6   :  { %v1806_v5 = vpop.f32.mrf.mxu2  ;;  %v1961_v7 = vpop.f32.mrf.mxu3 }
 0x1f7   :  { %v1807_v34 = vadd.f32 %v5144_v44, %v1806_v5  ;;  %v1962_v18 = vadd.f32 %v5144_v44, %v1961_v7  ;;  %v1463_v41 = vpop.f32.mrf.mxu0  ;;  %v1648_v17 = vpop.f32.mrf.mxu1  ;;  %2822 = vmatpush.bf16.msrb.mxu3 %v3976_v49 }
 0x1f8   :  { %v1464_v42 = vadd.f32 %v5144_v44, %v1463_v41  ;;  %v1649_v3 = vadd.f32 %v5144_v44, %v1648_v17 }
 0x1f9   :  { %v2173_v4 = vmax.f32 %v1807_v34, 0.0  ;;  %v2235_v22 = vmax.f32 %v1962_v18, 0.0 }
 0x1fa   :  { %v2036_v51 = vmax.f32 %v1464_v42, 0.0  ;;  %v2110_v59 = vmax.f32 %v1649_v3, 0.0  ;;  %v3951_v3 = vld [vmem:[%s5831_s3 + $0x60] sm:$0xf] }
 0x1fb   :  { %v2453_v25 = vadd.f32 %v2452_v56, %v2173_v4  ;;  %v5276_v40 = vadd.f32 %v2524_v23, %v2235_v22  ;;  %v4257_v23 = vld [vmem:[%s5830_s0 + $0x220] sm:$0xff]  ;;  %v3952_v21 = vor.u32 %v4333_v60, %v3951_v3 }
 0x1fc   :  { %v2296_v30 = vadd.f32 %v2295_v31, %v2036_v51  ;;  %v2380_v17 = vadd.f32 %v2379_v13, %v2110_v59 }
 0x1fd   :  { %5876 = vst [vmem:[#allocation38_spill] sm:$0xff] %v5276_v40  ;;  %2797 = vmatpush.bf16.msrb.mxu1 %v3952_v21 }
 0x1fe   :  { %v1808_v24 = vpop.f32.mrf.mxu2 }
 0x1ff   :  { %v1809_v31 = vadd.f32 %v5144_v44, %v1808_v24  ;;  %v1466_v5 = vpop.f32.mrf.mxu0  ;;  %v1651_v7 = vpop.f32.mrf.mxu1 }
 0x200   :  { %v1467_v34 = vadd.f32 %v5144_v44, %v1466_v5  ;;  %v1652_v18 = vadd.f32 %v5144_v44, %v1651_v7 }
 0x201   :  { %v2174_v41 = vmax.f32 %v1809_v31, 0.0 }
 0x202   :  { %v2037_v42 = vmax.f32 %v1467_v34, 0.0  ;;  %v2111_v56 = vmax.f32 %v1652_v18, 0.0  ;;  %3804 = vmatmul.msk.bf16.gmra.mxu0 %vm953_vm1, %v4220_v57  ;;  %3841 = vmatmul.msk.bf16.gmra.mxu1 %vm953_vm1, %v4257_v23 }
 0x203   :  { %v2454_v4 = vadd.f32 %v2453_v25, %v2174_v41  ;;  %v4221_v41 = vld [vmem:[%s5830_s0 + $0x100] sm:$0xff] }
 0x204   :  { %v2297_v22 = vadd.f32 %v2296_v30, %v2037_v42  ;;  %v2381_v51 = vadd.f32 %v2380_v17, %v2111_v56 }
 0x206   :  { %v1811_v49 = vpop.f32.mrf.mxu2 }
 0x207   :  { %v1812_v13 = vadd.f32 %v5144_v44, %v1811_v49  ;;  %v1468_v59 = vpop.f32.mrf.mxu0  ;;  %v1653_v24 = vpop.f32.mrf.mxu1 }
 0x208   :  { %v1469_v57 = vadd.f32 %v5144_v44, %v1468_v59  ;;  %v1654_v25 = vadd.f32 %v5144_v44, %v1653_v24  ;;  %v4331_v59 = vld [vmem:[%s5831_s3 + $0x64] sm:$0xf]  ;;  %v3953_v24 = vld [vmem:[%s5831_s3 + $0x70] sm:$0xf0] }
 0x209   :  { %v2175_v30 = vmax.f32 %v1812_v13, 0.0 }
 0x20a   :  { %v2038_v23 = vmax.f32 %v1469_v57, 0.0  ;;  %v2112_v31 = vmax.f32 %v1654_v25, 0.0  ;;  %v3956_v57 = vor.u32 %v4331_v59, %v3953_v24 }
 0x20b   :  { %v2455_v5 = vadd.f32 %v2454_v4, %v2175_v30 }
 0x20c   :  { %v2298_v7 = vadd.f32 %v2297_v22, %v2038_v23  ;;  %v2382_v34 = vadd.f32 %v2381_v51, %v2112_v31  ;;  %2810 = vmatpush.bf16.msrb.mxu2 %v3956_v57 }
 0x20e   :  { %v1813_v18 = vpop.f32.mrf.mxu2 }
 0x20f   :  { %v1814_v17 = vadd.f32 %v5144_v44, %v1813_v18  ;;  %v1471_v42 = vpop.f32.mrf.mxu0  ;;  %v1656_v56 = vpop.f32.mrf.mxu1 }
 0x210   :  { %v1472_v3 = vadd.f32 %v5144_v44, %v1471_v42  ;;  %v1657_v60 = vadd.f32 %v5144_v44, %v1656_v56 }
 0x211   :  { %v2176_v21 = vmax.f32 %v1814_v17, 0.0 }
 0x212   :  { %v2039_v49 = vmax.f32 %v1472_v3, 0.0  ;;  %v2113_v13 = vmax.f32 %v1657_v60, 0.0  ;;  %3805 = vmatmul.msk.bf16.gmra.mxu0 %vm953_vm1, %v4221_v41  ;;  %v4222_v60 = vld [vmem:[%s5830_s0 + $0x108] sm:$0xff] }
 0x213   :  { %v2456_v4 = vadd.f32 %v2455_v5, %v2176_v21 }
 0x214   :  { %v2299_v22 = vadd.f32 %v2298_v7, %v2039_v49  ;;  %v2383_v51 = vadd.f32 %v2382_v34, %v2113_v13 }
 0x216   :  { %v1816_v25 = vpop.f32.mrf.mxu2 }
 0x217   :  { %v1817_v30 = vadd.f32 %v5144_v44, %v1816_v25  ;;  %v1473_v23 = vpop.f32.mrf.mxu0  ;;  %v1658_v31 = vpop.f32.mrf.mxu1 }
 0x218   :  { %v1474_v18 = vadd.f32 %v5144_v44, %v1473_v23  ;;  %v1659_v5 = vadd.f32 %v5144_v44, %v1658_v31 }
 0x219   :  { %v2177_v7 = vmax.f32 %v1817_v30, 0.0 }
 0x21a   :  { %v2040_v34 = vmax.f32 %v1474_v18, 0.0  ;;  %v2114_v41 = vmax.f32 %v1659_v5, 0.0 }
 0x21b   :  { %v2457_v17 = vadd.f32 %v2456_v4, %v2177_v7 }
 0x21c   :  { %v2300_v42 = vadd.f32 %v2299_v22, %v2040_v34  ;;  %v2384_v56 = vadd.f32 %v2383_v51, %v2114_v41 }
 0x21e   :  { %v1818_v3 = vpop.f32.mrf.mxu2 }
 0x21f   :  { %v1819_v21 = vadd.f32 %v5144_v44, %v1818_v3  ;;  %v1476_v49 = vpop.f32.mrf.mxu0  ;;  %v1661_v13 = vpop.f32.mrf.mxu1 }
 0x220   :  { %v1477_v59 = vadd.f32 %v5144_v44, %v1476_v49  ;;  %v1662_v24 = vadd.f32 %v5144_v44, %v1661_v13 }
 0x221   :  { %v2178_v57 = vmax.f32 %v1819_v21, 0.0 }
 0x222   :  { %v2041_v25 = vmax.f32 %v1477_v59, 0.0  ;;  %v2115_v30 = vmax.f32 %v1662_v24, 0.0  ;;  %3806 = vmatmul.msk.bf16.gmra.mxu0 %vm953_vm1, %v4222_v60 }
 0x223   :  { %v2458_v4 = vadd.f32 %v2457_v17, %v2178_v57  ;;  %v4223_v17 = vld [vmem:[%s5830_s0 + $0x110] sm:$0xff] }
 0x224   :  { %v2301_v22 = vadd.f32 %v2300_v42, %v2041_v25  ;;  %v2385_v51 = vadd.f32 %v2384_v56, %v2115_v30 }
 0x226   :  { %v1821_v23 = vpop.f32.mrf.mxu2 }
 0x227   :  { %v1822_v31 = vadd.f32 %v5144_v44, %v1821_v23  ;;  %v1478_v18 = vpop.f32.mrf.mxu0  ;;  %v1663_v5 = vpop.f32.mrf.mxu1 }
 0x228   :  { %v1479_v7 = vadd.f32 %v5144_v44, %v1478_v18  ;;  %v1664_v34 = vadd.f32 %v5144_v44, %v1663_v5 }
 0x229   :  { %v2179_v41 = vmax.f32 %v1822_v31, 0.0 }
 0x22a   :  { %v2042_v3 = vmax.f32 %v1479_v7, 0.0  ;;  %v2116_v49 = vmax.f32 %v1664_v34, 0.0 }
 0x22b   :  { %v2459_v21 = vadd.f32 %v2458_v4, %v2179_v41 }
 0x22c   :  { %v2302_v13 = vadd.f32 %v2301_v22, %v2042_v3  ;;  %v2386_v59 = vadd.f32 %v2385_v51, %v2116_v49 }
 0x22e   :  { %v1823_v24 = vpop.f32.mrf.mxu2 }
 0x22f   :  { %v1824_v42 = vadd.f32 %v5144_v44, %v1823_v24  ;;  %v1481_v56 = vpop.f32.mrf.mxu0  ;;  %v1666_v60 = vpop.f32.mrf.mxu1 }
 0x230   :  { %v1482_v57 = vadd.f32 %v5144_v44, %v1481_v56  ;;  %v1667_v25 = vadd.f32 %v5144_v44, %v1666_v60 }
 0x231   :  { %v2180_v30 = vmax.f32 %v1824_v42, 0.0 }
 0x232   :  { %v2043_v23 = vmax.f32 %v1482_v57, 0.0  ;;  %v2117_v31 = vmax.f32 %v1667_v25, 0.0  ;;  %3807 = vmatmul.msk.bf16.gmra.mxu0 %vm953_vm1, %v4223_v17 }
 0x233   :  { %v2460_v4 = vadd.f32 %v2459_v21, %v2180_v30  ;;  %v4224_v21 = vld [vmem:[%s5830_s0 + $0x118] sm:$0xff] }
 0x234   :  { %v2303_v22 = vadd.f32 %v2302_v13, %v2043_v23  ;;  %v2387_v51 = vadd.f32 %v2386_v59, %v2117_v31 }
 0x236   :  { %v1826_v18 = vpop.f32.mrf.mxu2 }
 0x237   :  { %v1827_v5 = vadd.f32 %v5144_v44, %v1826_v18  ;;  %v1483_v7 = vpop.f32.mrf.mxu0  ;;  %v1668_v34 = vpop.f32.mrf.mxu1 }
 0x238   :  { %v1484_v41 = vadd.f32 %v5144_v44, %v1483_v7  ;;  %v1669_v3 = vadd.f32 %v5144_v44, %v1668_v34  ;;  %v3935_v34 = vld [vmem:[%s5831_s3 + $0x40] sm:$0xf] }
 0x239   :  { %v2181_v49 = vmax.f32 %v1827_v5, 0.0 }
 0x23a   :  { %v2044_v24 = vmax.f32 %v1484_v41, 0.0  ;;  %v2118_v56 = vmax.f32 %v1669_v3, 0.0  ;;  %v4329_v41 = vld [vmem:[%s5831_s3 + $0x4c] sm:$0xf0] }
 0x23b   :  { %v2461_v42 = vadd.f32 %v2460_v4, %v2181_v49 }
 0x23c   :  { %v2304_v60 = vadd.f32 %v2303_v22, %v2044_v24  ;;  %v5340_v57 = vadd.f32 %v2387_v51, %v2118_v56  ;;  %v3959_v22 = vld [vmem:[%s5831_s3 + $0x68] sm:$0xf]  ;;  %v4334_v51 = vld [vmem:[%s5831_s3 + $0x74] sm:$0xf0]  ;;  %v3936_v24 = vor.u32 %v4329_v41, %v3935_v34 }
 0x23d   :  { %v3960_v7 = vor.u32 %v4334_v51, %v3959_v22  ;;  %v4327_v22 = vld [vmem:[%s5831_s3 + $0x44] sm:$0xf] }
 0x23e   :  { %5877 = vst [vmem:[#allocation39_spill] sm:$0xff] %v5340_v57  ;;  %v1828_v17 = vpop.f32.mrf.mxu2  ;;  %2798 = vmatpush.bf16.msrb.mxu1 %v3936_v24 }
 0x23f   :  { %v1829_v13 = vadd.f32 %v5144_v44, %v1828_v17  ;;  %v1486_v59 = vpop.f32.mrf.mxu0  ;;  %v1671_v25 = vpop.f32.mrf.mxu1  ;;  %2823 = vmatpush.bf16.msrb.mxu3 %v3960_v7 }
 0x240   :  { %v1487_v30 = vadd.f32 %v5144_v44, %v1486_v59 }
 0x241   :  { %v2182_v23 = vmax.f32 %v1829_v13, 0.0 }
 0x242   :  { %v2045_v31 = vmax.f32 %v1487_v30, 0.0  ;;  %3808 = vmatmul.msk.bf16.gmra.mxu0 %vm953_vm1, %v4224_v21  ;;  %v4225_v21 = vld [vmem:[%s5830_s0 + $0x120] sm:$0xff] }
 0x243   :  { %v5348_v18 = vadd.f32 %v2461_v42, %v2182_v23 }
 0x244   :  { %v2305_v4 = vadd.f32 %v2304_v60, %v2045_v31 }
 0x245   :  { %5878 = vst [vmem:[#allocation40_spill] sm:$0xff] %v5348_v18 }
 0x246   :  { %v1831_v5 = vpop.f32.mrf.mxu2 }
 0x247   :  { %v1488_v3 = vpop.f32.mrf.mxu0  ;;  %v1673_v49 = vpop.f32.mrf.mxu1 }
 0x248   :  { %v1489_v56 = vadd.f32 %v5144_v44, %v1488_v3 }
 0x24a   :  { %v2046_v42 = vmax.f32 %v1489_v56, 0.0 }
 0x24c   :  { %v2306_v60 = vadd.f32 %v2305_v4, %v2046_v42  ;;  %v3937_v4 = vld [vmem:[%s5831_s3 + $0x50] sm:$0xf0] }
 0x24d   :  { %v3940_v51 = vor.u32 %v4327_v22, %v3937_v4  ;;  %v1672_v22 = vadd.f32 %v5144_v44, %v1671_v25  ;;  %v1674_v4 = vadd.f32 %v5144_v44, %v1673_v49 }
 0x24e   :  { %v1833_v17 = vpop.f32.mrf.mxu2 }
 0x24f   :  { %v1491_v13 = vpop.f32.mrf.mxu0  ;;  %v1676_v59 = vpop.f32.mrf.mxu1  ;;  %2811 = vmatpush.bf16.msrb.mxu2 %v3940_v51  ;;  %v1834_v18 = vadd.f32 %v5144_v44, %v1833_v17  ;;  %v2119_v43 = vmax.f32 %v1672_v22, 0.0  ;;  %v2120_v6 = vmax.f32 %v1674_v4, 0.0 }
 0x250   :  { %v1492_v30 = vadd.f32 %v5144_v44, %v1491_v13 }
 0x251   :  { %v2395_v49 = vadd.f32 %v2120_v6, %v2119_v43 }
 0x252   :  { %v2047_v23 = vmax.f32 %v1492_v30, 0.0  ;;  %3809 = vmatmul.msk.bf16.gmra.mxu0 %vm953_vm1, %v4225_v21 }
 0x254   :  { %v2307_v31 = vadd.f32 %v2306_v60, %v2047_v23  ;;  %v1832_v23 = vadd.f32 %v5144_v44, %v1831_v5 }
 0x256   :  { %v1836_v7 = vpop.f32.mrf.mxu2  ;;  %v2183_v40 = vmax.f32 %v1832_v23, 0.0 }
 0x257   :  { %v1493_v34 = vpop.f32.mrf.mxu0  ;;  %v1678_v41 = vpop.f32.mrf.mxu1 }
 0x258   :  { %v1494_v3 = vadd.f32 %v5144_v44, %v1493_v34  ;;  %v2184_v34 = vmax.f32 %v1834_v18, 0.0 }
 0x25a   :  { %v2048_v24 = vmax.f32 %v1494_v3, 0.0  ;;  %v2469_v17 = vadd.f32 %v2184_v34, %v2183_v40 }
 0x25c   :  { %v2308_v56 = vadd.f32 %v2307_v31, %v2048_v24  ;;  %v1837_v31 = vadd.f32 %v5144_v44, %v1836_v7 }
 0x25e   :  { %v1838_v42 = vpop.f32.mrf.mxu2  ;;  %v2185_v10 = vmax.f32 %v1837_v31, 0.0 }
 0x25f   :  { %v1496_v21 = vpop.f32.mrf.mxu0  ;;  %v1681_v60 = vpop.f32.mrf.mxu1  ;;  %v1839_v25 = vadd.f32 %v5144_v44, %v1838_v42 }
 0x260   :  { %v1497_v13 = vadd.f32 %v5144_v44, %v1496_v21  ;;  %v1677_v21 = vadd.f32 %v5144_v44, %v1676_v59  ;;  %v2470_v7 = vadd.f32 %v2469_v17, %v2185_v10 }
 0x261   :  { %v2186_v35 = vmax.f32 %v1839_v25, 0.0 }
 0x262   :  { %v2049_v30 = vmax.f32 %v1497_v13, 0.0 }
 0x263   :  { %v2471_v42 = vadd.f32 %v2470_v7, %v2186_v35 }
 0x264   :  { %v2309_v57 = vadd.f32 %v2308_v56, %v2049_v30  ;;  %v2121_v56 = vmax.f32 %v1677_v21, 0.0  ;;  %v1679_v30 = vadd.f32 %v5144_v44, %v1678_v41 }
 0x266   :  { %v1841_v51 = vpop.f32.mrf.mxu2  ;;  %v2396_v59 = vadd.f32 %v2395_v49, %v2121_v56  ;;  %v2122_v58 = vmax.f32 %v1679_v30, 0.0 }
 0x267   :  { %v1498_v3 = vpop.f32.mrf.mxu0  ;;  %v1683_v24 = vpop.f32.mrf.mxu1  ;;  %v1842_v22 = vadd.f32 %v5144_v44, %v1841_v51 }
 0x268   :  { %v1499_v5 = vadd.f32 %v5144_v44, %v1498_v3  ;;  %v1682_v3 = vadd.f32 %v5144_v44, %v1681_v60  ;;  %v2397_v41 = vadd.f32 %v2396_v59, %v2122_v58  ;;  %v1684_v10 = vadd.f32 %v5144_v44, %v1683_v24 }
 0x269   :  { %v2187_v6 = vmax.f32 %v1842_v22, 0.0  ;;  %v2278_v58 = vrot.slane %v5083_v32, 4 }
 0x26a   :  { %v2050_v13 = vmax.f32 %v1499_v5, 0.0  ;;  %v2124_v49 = vmax.f32 %v1684_v10, 0.0 }
 0x26b   :  { %v2472_v51 = vadd.f32 %v2471_v42, %v2187_v6 }
 0x26c   :  { %v2310_v18 = vadd.f32 %v2309_v57, %v2050_v13  ;;  %v2123_v57 = vmax.f32 %v1682_v3, 0.0  ;;  %v1852_v3 = vadd.f32 %v5144_v44, %v4618_v47  ;;  %v1857_v47 = vadd.f32 %v5144_v44, %v4648_v2 }
 0x26e   :  { %v1843_v23 = vpop.f32.mrf.mxu2  ;;  %v2398_v60 = vadd.f32 %v2397_v41, %v2123_v57  ;;  %v2193_v2 = vmax.f32 %v1857_v47, 0.0 }
 0x26f   :  { %v1501_v4 = vpop.f32.mrf.mxu0  ;;  %v1686_v52 = vpop.f32.mrf.mxu1  ;;  %v1844_v43 = vadd.f32 %v5144_v44, %v1843_v23 }
 0x270   :  { %v1502_v40 = vadd.f32 %v5144_v44, %v1501_v4  ;;  %v1687_v56 = vadd.f32 %v5144_v44, %v1686_v52  ;;  %v2399_v24 = vadd.f32 %v2398_v60, %v2124_v49  ;;  %v1697_v49 = vadd.f32 %v5144_v44, %v4616_v46 }
 0x271   :  { %v2188_v5 = vmax.f32 %v1844_v43, 0.0 }
 0x272   :  { %v2051_v34 = vmax.f32 %v1502_v40, 0.0  ;;  %v2279_v40 = vadd.f32 %v2278_v58, %v5083_v32  ;;  %v1862_v58 = vadd.f32 %v5144_v44, %v4678_v20 }
 0x273   :  { %v2473_v23 = vadd.f32 %v2472_v51, %v2188_v5  ;;  %v2191_v5 = vmax.f32 %v1852_v3, 0.0 }
 0x274   :  { %v2311_v31 = vadd.f32 %v2310_v18, %v2051_v34  ;;  %v2125_v18 = vmax.f32 %v1687_v56, 0.0  ;;  %v2280_v32 = vrot.slane %v2279_v40, 2 }
 0x276   :  { %v1846_v21 = vpop.f32.mrf.mxu2  ;;  %v2400_v43 = vadd.f32 %v2399_v24, %v2125_v18 }
 0x277   :  { %v1847_v13 = vadd.f32 %v5144_v44, %v1846_v21  ;;  %v1503_v17 = vpop.f32.mrf.mxu0  ;;  %v1688_v25 = vpop.f32.mrf.mxu1 }
 0x278   :  { %v1504_v35 = vadd.f32 %v5144_v44, %v1503_v17  ;;  %v1689_v4 = vadd.f32 %v5144_v44, %v1688_v25 }
 0x279   :  { %v2189_v7 = vmax.f32 %v1847_v13, 0.0 }
 0x27a   :  { %v2052_v30 = vmax.f32 %v1504_v35, 0.0  ;;  %v2126_v41 = vmax.f32 %v1689_v4, 0.0  ;;  %v1859_v35 = vadd.f32 %v5144_v44, %v4655_v9 }
 0x27b   :  { %v2474_v34 = vadd.f32 %v2473_v23, %v2189_v7  ;;  %v1864_v23 = vadd.f32 %v5144_v44, %v4685_v27  ;;  %v2281_v7 = vadd.f32 %v2280_v32, %v2279_v40  ;;  %v1867_v27 = vadd.f32 %v5144_v44, %v4708_v38  ;;  %v3919_v38 = vld [vmem:[%s5831_s3 + $0x20] sm:$0xf] }
 0x27c   :  { %v2312_v22 = vadd.f32 %v2311_v31, %v2052_v30  ;;  %v1854_v31 = vadd.f32 %v5144_v44, %v4625_v55  ;;  %v2401_v17 = vadd.f32 %v2400_v43, %v2126_v41  ;;  %v1699_v55 = vadd.f32 %v5144_v44, %v4623_v54 }
 0x27d   :  { %v2194_v3 = vmax.f32 %v1859_v35, 0.0  ;;  %v2282_v40 = vrot.slane %v2281_v7, 1  ;;  %v1702_v41 = vadd.f32 %v5144_v44, %v4646_v1  ;;  %v1869_v1 = vadd.f32 %v5144_v44, %v4715_v50 }
 0x27e   :  { %v1848_v59 = vpop.f32.mrf.mxu2  ;;  %v2192_v56 = vmax.f32 %v1854_v31, 0.0  ;;  %v2130_v54 = vmax.f32 %v1699_v55, 0.0  ;;  %v2197_v35 = vmax.f32 %v1867_v27, 0.0  ;;  %v1872_v50 = vadd.f32 %v5144_v44, %v4738_v0 }
 0x27f   :  { %v1849_v52 = vadd.f32 %v5144_v44, %v1848_v59  ;;  %v1506_v42 = vpop.f32.mrf.mxu0  ;;  %v1691_v6 = vpop.f32.mrf.mxu1  ;;  %v2129_v59 = vmax.f32 %v1697_v49, 0.0 }
 0x280   :  { %v1507_v57 = vadd.f32 %v5144_v44, %v1506_v42  ;;  %v1692_v10 = vadd.f32 %v5144_v44, %v1691_v6  ;;  %v2196_v6 = vmax.f32 %v1864_v23, 0.0 }
 0x281   :  { %v2190_v21 = vmax.f32 %v1849_v52, 0.0  ;;  %v2195_v52 = vmax.f32 %v1862_v58, 0.0  ;;  %v2131_v58 = vmax.f32 %v1702_v41, 0.0 }
 0x282   :  { %v2053_v51 = vmax.f32 %v1507_v57, 0.0  ;;  %v2127_v60 = vmax.f32 %v1692_v10, 0.0  ;;  %v5421_v57 = vpop.f32.mrf.mxu3 }
 0x283   :  { %v2475_v13 = vadd.f32 %v2474_v34, %v2190_v21  ;;  %v3943_v21 = vld [vmem:[%s5831_s3 + $0x48] sm:$0xf] }
 0x284   :  { %v2313_v25 = vadd.f32 %v2312_v22, %v2053_v51  ;;  %v2402_v46 = vadd.f32 %v2401_v17, %v2127_v60  ;;  %v4330_v51 = vld [vmem:[%s5831_s3 + $0x54] sm:$0xf0]  ;;  %v4323_v17 = vld [vmem:[%s5831_s3 + $0x24] sm:$0xf] }
 0x285   :  { %v2476_v30 = vadd.f32 %v2475_v13, %v2191_v5  ;;  %v1704_v5 = vadd.f32 %v5144_v44, %v4653_v8  ;;  %v3944_v32 = vor.u32 %v4330_v51, %v3943_v21  ;;  %v4325_v13 = vld [vmem:[%s5831_s3 + $0x2c] sm:$0xf0] }
 0x286   :  { %v3920_v8 = vor.u32 %v4325_v13, %v3919_v38 }
 0x287   :  { %v2477_v24 = vadd.f32 %v2476_v30, %v2192_v56  ;;  %v1508_v18 = vpop.f32.mrf.mxu0  ;;  %v1693_v22 = vpop.f32.mrf.mxu1  ;;  %2824 = vmatpush.bf16.msrb.mxu3 %v3944_v32 }
 0x288   :  { %v1509_v4 = vadd.f32 %v5144_v44, %v1508_v18  ;;  %v1694_v9 = vadd.f32 %v5144_v44, %v1693_v22  ;;  %2799 = vmatpush.bf16.msrb.mxu1 %v3920_v8  ;;  %v2198_v44 = vmax.f32 %v1869_v1, 0.0 }
 0x289   :  { %v2478_v34 = vadd.f32 %v2477_v24, %v2193_v2  ;;  %v5452_v2 = vld [vmem:[%s5829_s2] ss:$0 sm:$0xff] }
 0x28a   :  { %v2054_v42 = vmax.f32 %v1509_v4, 0.0  ;;  %v2128_v20 = vmax.f32 %v1694_v9, 0.0  ;;  %v1707_v23 = vadd.f32 %v5452_v2, %v4676_v19  ;;  %v1709_v0 = vadd.f32 %v5452_v2, %v4683_v26  ;;  %v5468_v41 = vpop.f32.mrf.mxu3 }
 0x28b   :  { %v2479_v43 = vadd.f32 %v2478_v34, %v2194_v3  ;;  %v1874_v22 = vadd.f32 %v5452_v2, %v4745_v12  ;;  %v2132_v4 = vmax.f32 %v1704_v5, 0.0  ;;  %v2283_v9 = vadd.f32 %v2282_v40, %v2281_v7 }
 0x28c   :  { %v2314_v10 = vadd.f32 %v2313_v25, %v2054_v42  ;;  %v2403_v31 = vadd.f32 %v2402_v46, %v2128_v20  ;;  %v3921_v25 = vld [vmem:[%s5831_s3 + $0x30] sm:$0xf0]  ;;  %v2199_v34 = vmax.f32 %v1872_v50, 0.0  ;;  %v1877_v19 = vadd.f32 %v5452_v2, %v4768_v29 }
 0x28d   :  { %v2480_v47 = vadd.f32 %v2479_v43, %v2195_v52  ;;  %v3924_v56 = vor.u32 %v4323_v17, %v3921_v25  ;;  %v1712_v42 = vadd.f32 %v5452_v2, %v4706_v37  ;;  %v2200_v27 = vmax.f32 %v1874_v22, 0.0 }
 0x28e   :  { %v2315_v60 = vrot.slane %v2314_v10, 4  ;;  %v2404_v49 = vadd.f32 %v2403_v31, %v2129_v59  ;;  %v1879_v12 = vadd.f32 %v5452_v2, %v4775_v39  ;;  %v1714_v7 = vadd.f32 %v5452_v2, %v4713_v48 }
 0x28f   :  { %v2481_v30 = vadd.f32 %v2480_v47, %v2196_v6  ;;  %v5447_v55 = vpop.f32.mrf.mxu0  ;;  %2812 = vmatpush.bf16.msrb.mxu2 %v3924_v56  ;;  %v2134_v6 = vmax.f32 %v1709_v0, 0.0  ;;  %v2543_v40 = vmul.f32 0.00390625, %v2283_v9  ;;  %v1717_v31 = vadd.f32 %v5452_v2, %v4736_v63 }
 0x290   :  { %v2316_v24 = vadd.f32 %v2315_v60, %v2314_v10  ;;  %v2405_v18 = vadd.f32 %v2404_v49, %v2130_v54  ;;  %v2133_v54 = vmax.f32 %v1707_v23, 0.0  ;;  %v2201_v37 = vmax.f32 %v1877_v19, 0.0 }
 0x291   :  { %v2482_v46 = vadd.f32 %v2481_v30, %v2197_v35  ;;  %v1882_v21 = vadd.f32 %v5452_v2, %v4798_v62  ;;  %v2135_v39 = vmax.f32 %v1712_v42, 0.0  ;;  %v1719_v5 = vadd.f32 %v5452_v2, %v4743_v11 }
 0x292   :  { %v2317_v59 = vrot.slane %v2316_v24, 2  ;;  %v2406_v3 = vadd.f32 %v2405_v18, %v2131_v58  ;;  %v2202_v47 = vmax.f32 %v1879_v12, 0.0  ;;  %v1884_v32 = vadd.f32 %v5452_v2, %v4805_v16 }
 0x293   :  { %v2483_v52 = vadd.f32 %v2482_v46, %v2198_v44  ;;  %v2136_v17 = vmax.f32 %v1714_v7, 0.0  ;;  %v2551_v63 = vpack.c.bf16 %v2543_v40, %v2543_v40  ;;  %v2137_v49 = vmax.f32 %v1717_v31, 0.0  ;;  %v4326_v7 = vld [vmem:[%s5831_s3 + $0x34] sm:$0xf0] }
 0x294   :  { %v2318_v20 = vadd.f32 %v2317_v59, %v2316_v24  ;;  %v2407_v26 = vadd.f32 %v2406_v3, %v2132_v4  ;;  %v2203_v62 = vmax.f32 %v1882_v21, 0.0  ;;  %v1887_v8 = vadd.f32 %v5452_v2, %v4834_v53  ;;  %v5881_v40 = vld [vmem:[#allocation29_spill] sm:$0xff]  ;;  %v5882_v21 = vld [vmem:[#allocation19_spill] sm:$0xff] }
 0x295   :  { %v2484_v43 = vadd.f32 %v2483_v52, %v2199_v34  ;;  %v2138_v35 = vmax.f32 %v1719_v5, 0.0  ;;  %v1722_v11 = vadd.f32 %v5452_v2, %v4766_v28  ;;  %v2204_v58 = vmax.f32 %v1884_v32, 0.0 }
 0x296   :  { %v2319_v29 = vrot.slane %v2318_v20, 1  ;;  %v2408_v10 = vadd.f32 %v2407_v26, %v2133_v54  ;;  %v1889_v16 = vadd.f32 %v5452_v2, %v4841_v14  ;;  %v1724_v24 = vadd.f32 %v5452_v2, %v4773_v36  ;;  %v5494_v14 = vpop.f32.mrf.mxu3 }
 0x297   :  { %v2485_v51 = vadd.f32 %v2484_v43, %v2200_v27  ;;  %v5474_v38 = vpop.f32.mrf.mxu0  ;;  %v2609_v18 = vunpack.c.l.b16 %v2551_v63  ;;  %v2205_v53 = vmax.f32 %v1887_v8, 0.0  ;;  %v1892_v22 = vadd.f32 %v5452_v2, %v4864_v45  ;;  %v5880_v27 = vld [vmem:[#allocation17_spill] sm:$0xff] }
 0x298   :  { %v2320_v48 = vadd.f32 %v2319_v29, %v2318_v20  ;;  %v2409_v1 = vadd.f32 %v2408_v10, %v2134_v6  ;;  %v2139_v4 = vmax.f32 %v1722_v11, 0.0  ;;  %v1727_v9 = vadd.f32 %v5452_v2, %v4796_v61  ;;  %v5879_v20 = vld [vmem:[#allocation26_spill] sm:$0xff] }
 0x299   :  { %v2486_v13 = vadd.f32 %v2485_v51, %v2201_v37  ;;  %v2206_v36 = vmax.f32 %v1889_v16, 0.0  ;;  %v1894_v34 = vadd.f32 %v5452_v2, %v4877_v33  ;;  %v2140_v52 = vmax.f32 %v1724_v24, 0.0  ;;  %v3927_v33 = vld [vmem:[%s5831_s3 + $0x28] sm:$0xf]  ;;  %v5887_v16 = vld [vmem:[#allocation36_spill] sm:$0xff] }
 0x29a   :  { %v2544_v25 = vmul.f32 0.00390625, %v2320_v48  ;;  %v2410_v60 = vadd.f32 %v2409_v1, %v2135_v39  ;;  %v1729_v45 = vadd.f32 %v5452_v2, %v4803_v15  ;;  %v2207_v42 = vmax.f32 %v1892_v22, 0.0  ;;  %v5883_v48 = vld [vmem:[#allocation32_spill] sm:$0xff] }
 0x29b   :  { %v2487_v56 = vadd.f32 %v2486_v13, %v2202_v47  ;;  %v1897_v26 = vadd.f32 %v5452_v2, %v5879_v20  ;;  %v2141_v6 = vmax.f32 %v1727_v9, 0.0  ;;  %v1732_v12 = vadd.f32 %v5452_v2, %v5880_v27  ;;  %v5891_v20 = vld [vmem:[#allocation31_spill] sm:$0xff] }
 0x29c   :  { %v2552_v50 = vpack.c.bf16 %v2544_v25, %v2544_v25  ;;  %v2411_v30 = vadd.f32 %v2410_v60, %v2136_v17  ;;  %v2208_v15 = vmax.f32 %v1894_v34, 0.0  ;;  %v1899_v29 = vadd.f32 %v5452_v2, %v5881_v40  ;;  %v5884_v17 = vld [vmem:[#allocation21_spill] sm:$0xff] }
 0x29d   :  { %v2488_v23 = vadd.f32 %v2487_v56, %v2203_v62  ;;  %v3928_v10 = vor.u32 %v4326_v7, %v3927_v33  ;;  %v2142_v37 = vmax.f32 %v1729_v45, 0.0  ;;  %v1734_v51 = vadd.f32 %v5452_v2, %v5882_v21 }
 0x29e   :  { %v2610_v0 = vunpack.c.l.b16 %v2552_v50  ;;  %v2412_v44 = vadd.f32 %v2411_v30, %v2137_v49  ;;  %v2209_v5 = vmax.f32 %v1897_v26, 0.0  ;;  %v1902_v1 = vadd.f32 %v5452_v2, %v5883_v48  ;;  %v5885_v49 = vld [vmem:[#allocation35_spill] sm:$0xff]  ;;  %v5524_v50 = vpop.f32.mrf.mxu3 }
 0x29f   :  { %v2489_v46 = vadd.f32 %v2488_v23, %v2204_v58  ;;  %v5490_v28 = vpop.f32.mrf.mxu0  ;;  %2825 = vmatpush.bf16.msrb.mxu3 %v3928_v10  ;;  %v2143_v13 = vmax.f32 %v1732_v12, 0.0  ;;  %v1737_v63 = vadd.f32 %v5452_v2, %v5884_v17  ;;  %v2210_v60 = vmax.f32 %v1899_v29, 0.0 }
 0x2a0   :  { %v5496_v59 = vsel %vm2617_vm2, %v2610_v0, %v2609_v18  ;;  %v2413_v3 = vadd.f32 %v2412_v44, %v2138_v35  ;;  %v1904_v62 = vadd.f32 %v5452_v2, %v5885_v49  ;;  %v2144_v56 = vmax.f32 %v1734_v51, 0.0  ;;  %v5886_v35 = vld [vmem:[#allocation23_spill] sm:$0xff]  ;;  %v5888_v0 = vld [vmem:[#allocation25_spill] sm:$0xff] }
 0x2a1   :  { %v2490_v19 = vadd.f32 %v2489_v46, %v2205_v53  ;;  %v1739_v11 = vadd.f32 %v5452_v2, %v5886_v35  ;;  %v2211_v58 = vmax.f32 %v1902_v1, 0.0  ;;  %v1907_v23 = vadd.f32 %v5452_v2, %v5887_v16  ;;  %v5889_v46 = vld [vmem:[#allocation37_spill] sm:$0xff] }
 0x2a2   :  { %v2414_v54 = vadd.f32 %v2413_v3, %v2139_v4  ;;  %v2145_v18 = vmax.f32 %v1737_v63, 0.0  ;;  %v1742_v44 = vadd.f32 %v5452_v2, %v5888_v0  ;;  %v2212_v22 = vmax.f32 %v1904_v62, 0.0 }
 0x2a3   :  { %v2491_v61 = vadd.f32 %v2490_v19, %v2206_v36  ;;  %v1909_v4 = vadd.f32 %v5452_v2, %v5889_v46  ;;  %v2146_v3 = vmax.f32 %v1739_v11, 0.0  ;;  %v5890_v36 = vld [vmem:[#allocation28_spill] sm:$0xff]  ;;  %v1747_v26 = vadd.f32 %v5452_v2, %v5891_v20 }
 0x2a4   :  { %v2415_v43 = vadd.f32 %v2414_v54, %v2140_v52  ;;  %v1744_v34 = vadd.f32 %v5452_v2, %v5890_v36  ;;  %v2213_v52 = vmax.f32 %v1907_v23, 0.0  ;;  %v1514_v48 = vadd.f32 %v5452_v2, %v5474_v38 }
 0x2a5   :  { %v2492_v31 = vadd.f32 %v2491_v61, %v2207_v42  ;;  %v2147_v42 = vmax.f32 %v1742_v44, 0.0  ;;  %v2149_v40 = vmax.f32 %v1747_v26, 0.0  ;;  %v1512_v1 = vadd.f32 %v5452_v2, %v5447_v55 }
 0x2a6   :  { %v2416_v39 = vadd.f32 %v2415_v43, %v2141_v6  ;;  %v2214_v6 = vmax.f32 %v1909_v4, 0.0  ;;  %v2148_v12 = vmax.f32 %v1744_v34, 0.0  ;;  %v5892_v43 = vld [vmem:[#allocation34_spill] sm:$0xff]  ;;  %v1973_v29 = vpop.f32.mrf.mxu3  ;;  %v2056_v63 = vmax.f32 %v1514_v48, 0.0  ;;  %v5897_v48 = vld [vmem:[#allocation5_spill] sm:$0xff] }
 0x2a7   :  { %v1518_v47 = vpop.f32.mrf.mxu0  ;;  %v2493_v32 = vadd.f32 %v2492_v31, %v2208_v15  ;;  %v1749_v33 = vadd.f32 %v5452_v2, %v5892_v43  ;;  %v1969_v4 = vadd.f32 %v5452_v2, %v5494_v14  ;;  %v5896_v14 = vld [vmem:[#allocation4_spill] sm:$0xff] }
 0x2a8   :  { %v2417_v25 = vadd.f32 %v2416_v39, %v2142_v37 }
 0x2a9   :  { %v2494_v8 = vadd.f32 %v2493_v32, %v2209_v5  ;;  %v2150_v31 = vmax.f32 %v1749_v33, 0.0  ;;  %v1517_v32 = vadd.f32 %v5452_v2, %v5490_v28 }
 0x2aa   :  { %v2418_v30 = vadd.f32 %v2417_v25, %v2143_v13  ;;  %v1519_v25 = vadd.f32 %v5452_v2, %v1518_v47 }
 0x2ab   :  { %v2495_v24 = vadd.f32 %v2494_v8, %v2210_v60  ;;  %v2055_v60 = vmax.f32 %v1512_v1, 0.0  ;;  %v2057_v49 = vmax.f32 %v1517_v32, 0.0  ;;  %v1964_v8 = vadd.f32 %v5452_v2, %v5421_v57 }
 0x2ac   :  { %v2419_v53 = vadd.f32 %v2418_v30, %v2144_v56  ;;  %v2058_v56 = vmax.f32 %v1519_v25, 0.0  ;;  %v1544_v1 = vadd.f32 %v5452_v2, %v5897_v48 }
 0x2ad   :  { %v2496_v9 = vadd.f32 %v2495_v24, %v2211_v58  ;;  %v2321_v38 = vadd.f32 %v2056_v63, %v2055_v60  ;;  %v2236_v30 = vmax.f32 %v1964_v8, 0.0  ;;  %v1967_v58 = vadd.f32 %v5452_v2, %v5468_v41  ;;  %v4319_v63 = vld [vmem:[%s5831_s3 + $0x4] sm:$0xf]  ;;  %v3911_v8 = vld [vmem:[%s5831_s3 + $0x8] sm:$0xf] }
 0x2ae   :  { %v2420_v19 = vadd.f32 %v2419_v53, %v2145_v18  ;;  %v1976_v39 = vpop.f32.mrf.mxu3  ;;  %v5893_v53 = vld [vmem:[#allocation38_spill] sm:$0xff] }
 0x2af   :  { %v1521_v45 = vpop.f32.mrf.mxu0  ;;  %v2497_v54 = vadd.f32 %v2496_v9, %v2212_v22  ;;  %v2322_v35 = vadd.f32 %v2321_v38, %v2057_v49  ;;  %v2526_v22 = vadd.f32 %v5893_v53, %v2236_v30  ;;  %v2237_v46 = vmax.f32 %v1967_v58, 0.0  ;;  %v4322_v38 = vld [vmem:[%s5831_s3 + $0x14] sm:$0xf0]  ;;  %v4025_v30 = vld [vmem:[%s5831_s3 + $0xf8] sm:$0xf0] }
 0x2b0   :  { %v2421_v61 = vadd.f32 %v2420_v19, %v2146_v3  ;;  %v1522_v62 = vadd.f32 %v5452_v2, %v1521_v45  ;;  %v2238_v19 = vmax.f32 %v1969_v4, 0.0  ;;  %v1977_v60 = vadd.f32 %v5452_v2, %v1976_v39  ;;  %v4348_v39 = vld [vmem:[%s5831_s3 + $0xec] sm:$0xf] }
 0x2b1   :  { %v2498_v27 = vadd.f32 %v2497_v54, %v2213_v52  ;;  %v2323_v16 = vadd.f32 %v2322_v35, %v2058_v56  ;;  %v2527_v34 = vadd.f32 %v2526_v22, %v2237_v46  ;;  %v1972_v52 = vadd.f32 %v5452_v2, %v5524_v50  ;;  %v5894_v54 = vld [vmem:[#allocation2_spill] sm:$0xff]  ;;  %v4344_v58 = vld [vmem:[%s5831_s3 + $0xcc] sm:$0xf] }
 0x2b2   :  { %v2422_v7 = vadd.f32 %v2421_v61, %v2147_v42  ;;  %v2059_v11 = vmax.f32 %v1522_v62, 0.0  ;;  %v1537_v42 = vadd.f32 %v5452_v2, %v5894_v54  ;;  %v5895_v61 = vld [vmem:[#allocation3_spill] sm:$0xff]  ;;  %v3905_v62 = vld [vmem:[%s5831_s3 + $0x10] sm:$0xf0]  ;;  %v5898_v56 = vld [vmem:[#allocation6_spill] sm:$0xff]  ;;  %v2241_v53 = vmax.f32 %v1977_v60, 0.0 }
 0x2b3   :  { %v5538_v15 = vadd.f32 %v2498_v27, %v2214_v6  ;;  %v1539_v6 = vadd.f32 %v5452_v2, %v5895_v61  ;;  %v1542_v27 = vadd.f32 %v5452_v2, %v5896_v14  ;;  %v5902_v14 = vld [vmem:[#allocation10_spill] sm:$0xff] }
 0x2b4   :  { %v2423_v10 = vadd.f32 %v2422_v7, %v2148_v12  ;;  %v2324_v57 = vadd.f32 %v2323_v16, %v2059_v11  ;;  %v1974_v12 = vadd.f32 %v5452_v2, %v1973_v29  ;;  %v2528_v7 = vadd.f32 %v2527_v34, %v2238_v19  ;;  %v4321_v29 = vld [vmem:[%s5831_s3 + $0xc] sm:$0xf0]  ;;  %v4009_v16 = vld [vmem:[%s5831_s3 + $0xd8] sm:$0xf0] }
 0x2b5   :  { %v2065_v50 = vmax.f32 %v1537_v42, 0.0  ;;  %v3908_v11 = vor.u32 %v4319_v63, %v3905_v62  ;;  %v4012_v46 = vor.u32 %v4344_v58, %v4009_v16  ;;  %v3993_v34 = vld [vmem:[%s5831_s3 + $0xb8] sm:$0xf0] }
 0x2b6   :  { %v2424_v37 = vadd.f32 %v2423_v10, %v2149_v40  ;;  %v5548_v17 = vpop.f32.mrf.mxu3  ;;  %v2239_v40 = vmax.f32 %v1972_v52, 0.0  ;;  %v5901_v52 = vld [vmem:[#allocation9_spill] sm:$0xff] }
 0x2b7   :  { %v1523_v21 = vpop.f32.mrf.mxu0  ;;  %2813 = vmatpush.bf16.msrb.mxu2 %v3908_v11  ;;  %v1979_v22 = vadd.f32 %v5452_v2, %v5548_v17  ;;  %v5905_v63 = vld [vmem:[#allocation13_spill] sm:$0xff] }
 0x2b8   :  { %v5540_v51 = vadd.f32 %v2424_v37, %v2150_v31  ;;  %v1524_v55 = vadd.f32 %v5452_v2, %v1523_v21  ;;  %v2066_v37 = vmax.f32 %v1539_v6, 0.0  ;;  %v2067_v21 = vmax.f32 %v1542_v27, 0.0 }
 0x2b9   :  { %v2529_v25 = vadd.f32 %v2528_v7, %v2239_v40  ;;  %v1557_v27 = vadd.f32 %v5452_v2, %v5902_v14  ;;  %v5903_v40 = vld [vmem:[#allocation11_spill] sm:$0xff] }
 0x2ba   :  { %v2060_v23 = vmax.f32 %v1524_v55, 0.0  ;;  %v1547_v55 = vadd.f32 %v5452_v2, %v5898_v56  ;;  %v5906_v56 = vld [vmem:[#allocation14_spill] sm:$0xff] }
 0x2bb   :  { %v2073_v48 = vmax.f32 %v1557_v27, 0.0  ;;  %v2426_v27 = vrot.slane %v5540_v51, 4 }
 0x2bc   :  { %v2325_v9 = vadd.f32 %v2324_v57, %v2060_v23  ;;  %v2068_v23 = vmax.f32 %v1544_v1, 0.0  ;;  %v2069_v4 = vmax.f32 %v1547_v55, 0.0  ;;  %v5904_v1 = vld [vmem:[#allocation12_spill] sm:$0xff] }
 0x2be   :  { %v5559_v18 = vpop.f32.mrf.mxu3 }
 0x2bf   :  { %v1526_v5 = vpop.f32.mrf.mxu0 }
 0x2c0   :  { %v1527_v28 = vadd.f32 %v5452_v2, %v1526_v5  ;;  %v2240_v5 = vmax.f32 %v1974_v12, 0.0 }
 0x2c2   :  { %v2061_v0 = vmax.f32 %v1527_v28, 0.0  ;;  %v3912_v28 = vor.u32 %v4322_v38, %v3911_v8 }
 0x2c4   :  { %v2326_v41 = vadd.f32 %v2325_v9, %v2061_v0  ;;  %2826 = vmatpush.bf16.msrb.mxu3 %v3912_v28  ;;  %v5900_v9 = vld [vmem:[#allocation8_spill] sm:$0xff]  ;;  %v5907_v28 = vld [vmem:[#allocation15_spill] sm:$0xff] }
 0x2c6   :  { %v1983_v10 = vpop.f32.mrf.mxu3 }
 0x2c7   :  { %v1528_v13 = vpop.f32.mrf.mxu0 }
 0x2c8   :  { %v1529_v24 = vadd.f32 %v5452_v2, %v1528_v13  ;;  %v3903_v13 = vld [vmem:[%s5831_s3] sm:$0xf] }
 0x2c9   :  { %v3904_v49 = vor.u32 %v4321_v29, %v3903_v13 }
 0x2ca   :  { %v2062_v3 = vmax.f32 %v1529_v24, 0.0  ;;  %v5899_v24 = vld [vmem:[#allocation7_spill] sm:$0xff] }
 0x2cb   :  { %2800 = vmatpush.bf16.msrb.mxu1 %v3904_v49  ;;  %v1549_v57 = vadd.f32 %v5452_v2, %v5899_v24  ;;  %v5908_v24 = vld [vmem:[#allocation16_spill] sm:$0xff] }
 0x2cc   :  { %v2327_v20 = vadd.f32 %v2326_v41, %v2062_v3  ;;  %v1552_v3 = vadd.f32 %v5452_v2, %v5900_v9 }
 0x2cd   :  { %v2070_v19 = vmax.f32 %v1549_v57, 0.0  ;;  %v1572_v57 = vadd.f32 %v5452_v2, %v5908_v24  ;;  %v3929_v24 = vld [vmem:[%s5831_s3 + $0x38] sm:$0xf0] }
 0x2ce   :  { %v1986_v17 = vpop.f32.mrf.mxu3  ;;  %v2071_v6 = vmax.f32 %v1552_v3, 0.0 }
 0x2cf   :  { %v1531_v47 = vpop.f32.mrf.mxu0  ;;  %v1987_v8 = vadd.f32 %v5452_v2, %v1986_v17  ;;  %v2079_v3 = vmax.f32 %v1572_v57, 0.0 }
 0x2d0   :  { %v1532_v44 = vadd.f32 %v5452_v2, %v1531_v47  ;;  %v4028_v47 = vor.u32 %v4348_v39, %v4025_v30  ;;  %v1569_v39 = vadd.f32 %v5452_v2, %v5907_v28 }
 0x2d2   :  { %v2063_v36 = vmax.f32 %v1532_v44, 0.0  ;;  %v2530_v44 = vadd.f32 %v2529_v25, %v2240_v5  ;;  %2832 = vmatpush.bf16.msra.mxu1 %v4028_v47  ;;  %v1564_v25 = vadd.f32 %v5452_v2, %v5905_v63  ;;  %v2245_v47 = vmax.f32 %v1987_v8, 0.0  ;;  %v5917_v63 = vld [vmem:[#allocation33_spill] sm:$0xff] }
 0x2d4   :  { %v2328_v43 = vadd.f32 %v2327_v20, %v2063_v36  ;;  %v4340_v36 = vld [vmem:[%s5831_s3 + $0xac] sm:$0xf]  ;;  %v2531_v42 = vadd.f32 %v2530_v44, %v2241_v53  ;;  %v2242_v20 = vmax.f32 %v1979_v22, 0.0  ;;  %v2076_v11 = vmax.f32 %v1564_v25, 0.0  ;;  %v5909_v53 = vld [vmem:[#allocation18_spill] sm:$0xff] }
 0x2d5   :  { %v3996_v61 = vor.u32 %v4340_v36, %v3993_v34  ;;  %v2078_v44 = vmax.f32 %v1569_v39, 0.0  ;;  %v1574_v22 = vadd.f32 %v5452_v2, %v5909_v53  ;;  %v1589_v25 = vadd.f32 %v5452_v2, %v5917_v63 }
 0x2d6   :  { %2833 = vmatpush.bf16.msra.mxu1 %v4012_v46  ;;  %v1988_v55 = vpop.f32.mrf.mxu3 }
 0x2d7   :  { %v1533_v45 = vpop.f32.mrf.mxu0  ;;  %v1989_v16 = vadd.f32 %v5452_v2, %v1988_v55  ;;  %v2086_v28 = vmax.f32 %v1589_v25, 0.0  ;;  %v4356_v25 = vld [vmem:[%s5832_s5 + $0x28] sm:$0xff] }
 0x2d8   :  { %v1534_v26 = vadd.f32 %v5452_v2, %v1533_v45  ;;  %v1554_v45 = vadd.f32 %v5452_v2, %v5901_v52  ;;  %v5911_v52 = vld [vmem:[#allocation22_spill] sm:$0xff] }
 0x2d9   :  { %v2246_v9 = vmax.f32 %v1989_v16, 0.0 }
 0x2da   :  { %v2064_v33 = vmax.f32 %v1534_v26, 0.0  ;;  %v1982_v26 = vadd.f32 %v5452_v2, %v5559_v18  ;;  %v2072_v7 = vmax.f32 %v1554_v45, 0.0  ;;  %2834 = vmatpush.bf16.msra.mxu1 %v3996_v61  ;;  %v1579_v45 = vadd.f32 %v5452_v2, %v5911_v52  ;;  %v5913_v61 = vld [vmem:[#allocation24_spill] sm:$0xff] }
 0x2dc   :  { %v2329_v31 = vadd.f32 %v2328_v43, %v2064_v33  ;;  %v4336_v43 = vld [vmem:[%s5831_s3 + $0x8c] sm:$0xf]  ;;  %v3977_v33 = vld [vmem:[%s5831_s3 + $0x98] sm:$0xf0] }
 0x2dd   :  { %v3980_v5 = vor.u32 %v4336_v43, %v3977_v33  ;;  %v2082_v33 = vmax.f32 %v1579_v45, 0.0 }
 0x2de   :  { %v2330_v32 = vadd.f32 %v2329_v31, %v2065_v50  ;;  %v1559_v50 = vadd.f32 %v5452_v2, %v5903_v40  ;;  %v2532_v31 = vadd.f32 %v2531_v42, %v2242_v20 }
 0x2df   :  { %2835 = vmatpush.bf16.msra.mxu1 %v3980_v5  ;;  %v5916_v5 = vld [vmem:[#allocation30_spill] sm:$0xff] }
 0x2e0   :  { %v2331_v35 = vadd.f32 %v2330_v32, %v2066_v37  ;;  %v2243_v37 = vmax.f32 %v1982_v26, 0.0  ;;  %v1562_v32 = vadd.f32 %v5452_v2, %v5904_v1  ;;  %v2074_v29 = vmax.f32 %v1559_v50, 0.0 }
 0x2e2   :  { %v2332_v0 = vadd.f32 %v2331_v35, %v2067_v21  ;;  %v1984_v21 = vadd.f32 %v5452_v2, %v1983_v10  ;;  %v2533_v49 = vadd.f32 %v2532_v31, %v2243_v37  ;;  %v2075_v38 = vmax.f32 %v1562_v32, 0.0 }
 0x2e3   :  { %v1567_v10 = vadd.f32 %v5452_v2, %v5906_v56  ;;  %v2427_v32 = vadd.f32 %v2426_v27, %v5540_v51  ;;  %v3961_v56 = vld [vmem:[%s5831_s3 + $0x78] sm:$0xf0] }
 0x2e4   :  { %v2333_v41 = vadd.f32 %v2332_v0, %v2068_v23  ;;  %v2244_v62 = vmax.f32 %v1984_v21, 0.0 }
 0x2e5   :  { %v2077_v23 = vmax.f32 %v1567_v10, 0.0  ;;  %v2428_v55 = vrot.slane %v2427_v32, 2 }
 0x2e6   :  { %v2334_v54 = vadd.f32 %v2333_v41, %v2069_v4  ;;  %v2534_v58 = vadd.f32 %v2533_v49, %v2244_v62  ;;  %v5910_v41 = vld [vmem:[#allocation20_spill] sm:$0xff] }
 0x2e7   :  { %v1577_v36 = vadd.f32 %v5452_v2, %v5910_v41  ;;  %v3913_v41 = vld [vmem:[%s5831_s3 + $0x18] sm:$0xf0] }
 0x2e8   :  { %v2335_v12 = vadd.f32 %v2334_v54, %v2070_v19  ;;  %v2535_v4 = vadd.f32 %v2534_v58, %v2245_v47  ;;  %v2080_v19 = vmax.f32 %v1574_v22, 0.0  ;;  %v5912_v54 = vld [vmem:[#allocation39_spill] sm:$0xff] }
 0x2e9   :  { %v2389_v42 = vrot.slane %v5912_v54, 4  ;;  %v2081_v26 = vmax.f32 %v1577_v36, 0.0 }
 0x2ea   :  { %v2336_v18 = vadd.f32 %v2335_v12, %v2071_v6  ;;  %v2536_v20 = vadd.f32 %v2535_v4, %v2246_v9  ;;  %v1582_v6 = vadd.f32 %v5452_v2, %v5913_v61  ;;  %v5914_v12 = vld [vmem:[#allocation40_spill] sm:$0xff] }
 0x2eb   :  { %v2463_v43 = vrot.slane %v5914_v12, 4  ;;  %v2390_v31 = vadd.f32 %v2389_v42, %v5912_v54 }
 0x2ec   :  { %v2337_v13 = vadd.f32 %v2336_v18, %v2072_v7  ;;  %v5915_v7 = vld [vmem:[#allocation27_spill] sm:$0xff]  ;;  %v2500_v18 = vrot.slane %v5538_v15, 4  ;;  %v2537_v37 = vrot.slane %v2536_v20, 4  ;;  %v2083_v21 = vmax.f32 %v1582_v6, 0.0 }
 0x2ed   :  { %v1584_v40 = vadd.f32 %v5452_v2, %v5915_v7  ;;  %v2391_v62 = vrot.slane %v2390_v31, 2  ;;  %v4358_v7 = vld [vmem:[%s5832_s5 + $0x38] sm:$0xff] }
 0x2ee   :  { %v2338_v60 = vadd.f32 %v2337_v13, %v2073_v48  ;;  %v1587_v48 = vadd.f32 %v5452_v2, %v5916_v5  ;;  %v2464_v13 = vadd.f32 %v2463_v43, %v5914_v12  ;;  %v2501_v49 = vadd.f32 %v2500_v18, %v5538_v15  ;;  %v4328_v2 = vld [vmem:[%s5831_s3 + $0x4c] sm:$0xf]  ;;  %v3945_v15 = vld [vmem:[%s5831_s3 + $0x58] sm:$0xf0]  ;;  %3113 = vmatpush.bf16.msra.mxu2 %v4358_v7 }
 0x2ef   :  { %v2538_v8 = vadd.f32 %v2537_v37, %v2536_v20  ;;  %v3948_v58 = vor.u32 %v4328_v2, %v3945_v15  ;;  %v2392_v47 = vadd.f32 %v2391_v62, %v2390_v31  ;;  %v4357_v37 = vld [vmem:[%s5832_s5 + $0x30] sm:$0xff]  ;;  %v4364_v62 = vld [vmem:[%s5832_s5 + $0x68] sm:$0xff]  ;;  %v4363_v15 = vld [vmem:[%s5832_s5 + $0x60] sm:$0xff] }
 0x2f0   :  { %v2339_v35 = vadd.f32 %v2338_v60, %v2074_v29  ;;  %v2084_v29 = vmax.f32 %v1584_v40, 0.0  ;;  %v2085_v51 = vmax.f32 %v1587_v48, 0.0  ;;  %v4365_v48 = vld [vmem:[%s5832_s5 + $0x70] sm:$0xff] }
 0x2f1   :  { %v2539_v16 = vrot.slane %v2538_v8, 2  ;;  %v2393_v4 = vrot.slane %v2392_v47, 1 }
 0x2f2   :  { %v2340_v30 = vadd.f32 %v2339_v35, %v2075_v38  ;;  %v4332_v38 = vld [vmem:[%s5831_s3 + $0x6c] sm:$0xf]  ;;  %3114 = vmatpush.bf16.msra.mxu2 %v4357_v37 }
 0x2f3   :  { %v3964_v35 = vor.u32 %v4332_v38, %v3961_v56  ;;  %v2540_v9 = vadd.f32 %v2539_v16, %v2538_v8  ;;  %v2394_v54 = vadd.f32 %v2393_v4, %v2392_v47  ;;  %v4362_v47 = vld [vmem:[%s5832_s5 + $0x58] sm:$0xff]  ;;  %v4373_v16 = vld [vmem:[%s5832_s5 + $0xb0] sm:$0xff]  ;;  %v4380_v4 = vld [vmem:[%s5832_s5 + $0xe8] sm:$0xff] }
 0x2f4   :  { %v2341_v0 = vadd.f32 %v2340_v30, %v2076_v11  ;;  %v2465_v11 = vrot.slane %v2464_v13, 2  ;;  %v2502_v30 = vrot.slane %v2501_v49, 2 }
 0x2f5   :  { %2836 = vmatpush.bf16.msra.mxu1 %v3964_v35  ;;  %v2541_v42 = vrot.slane %v2540_v9, 1  ;;  %v2546_v27 = vmul.f32 0.00390625, %v2394_v54  ;;  %v4355_v35 = vld [vmem:[%s5832_s5 + $0x20] sm:$0xff]  ;;  %v4376_v54 = vld [vmem:[%s5832_s5 + $0xc8] sm:$0xff] }
 0x2f6   :  { %v2342_v46 = vadd.f32 %v2341_v0, %v2077_v23  ;;  %v4324_v23 = vld [vmem:[%s5831_s3 + $0x2c] sm:$0xf]  ;;  %v2429_v0 = vadd.f32 %v2428_v55, %v2427_v32  ;;  %v2503_v22 = vadd.f32 %v2502_v30, %v2501_v49  ;;  %3115 = vmatpush.bf16.msra.mxu2 %v4356_v25 }
 0x2f7   :  { %v2542_v12 = vadd.f32 %v2541_v42, %v2540_v9  ;;  %v4361_v9 = vld [vmem:[%s5832_s5 + $0x50] sm:$0xff]  ;;  %v4375_v42 = vld [vmem:[%s5832_s5 + $0xc0] sm:$0xff] }
 0x2f8   :  { %v2343_v34 = vadd.f32 %v2342_v46, %v2078_v44  ;;  %v2466_v44 = vadd.f32 %v2465_v11, %v2464_v13  ;;  %v3932_v46 = vor.u32 %v4324_v23, %v3929_v24  ;;  %v2504_v45 = vrot.slane %v2503_v22, 1  ;;  %v4353_v23 = vld [vmem:[%s5832_s5 + $0x10] sm:$0xff]  ;;  %v4372_v24 = vld [vmem:[%s5832_s5 + $0xa8] sm:$0xff] }
 0x2f9   :  { %2837 = vmatpush.bf16.msra.mxu1 %v3948_v58  ;;  %v2550_v5 = vmul.f32 0.00390625, %v2542_v12  ;;  %v4354_v58 = vld [vmem:[%s5832_s5 + $0x18] sm:$0xff] }
 0x2fa   :  { %v2344_v17 = vadd.f32 %v2343_v34, %v2079_v3  ;;  %v4320_v3 = vld [vmem:[%s5831_s3 + $0xc] sm:$0xf]  ;;  %v2430_v34 = vrot.slane %v2429_v0, 1  ;;  %3116 = vmatpush.bf16.msra.mxu2 %v4355_v35 }
 0x2fb   :  { %v2558_v49 = vpack.c.bf16 %v2550_v5, %v2550_v5 }
 0x2fc   :  { %v2345_v14 = vadd.f32 %v2344_v17, %v2080_v19  ;;  %v2467_v19 = vrot.slane %v2466_v44, 1  ;;  %v3916_v17 = vor.u32 %v4320_v3, %v3913_v41  ;;  %v4369_v3 = vld [vmem:[%s5832_s5 + $0x90] sm:$0xff]  ;;  %v4379_v41 = vld [vmem:[%s5832_s5 + $0xe0] sm:$0xff] }
 0x2fd   :  { %2838 = vmatpush.bf16.msra.mxu1 %v3932_v46  ;;  %v2616_v11 = vunpack.c.l.b16 %v2558_v49  ;;  %v4381_v46 = vld [vmem:[%s5832_s5 + $0xf0] sm:$0xff] }
 0x2fe   :  { %v2346_v50 = vadd.f32 %v2345_v14, %v2081_v26  ;;  %v2431_v26 = vadd.f32 %v2430_v34, %v2429_v0  ;;  %v2468_v61 = vadd.f32 %v2467_v19, %v2466_v44  ;;  %v2505_v14 = vadd.f32 %v2504_v45, %v2503_v22  ;;  %3117 = vmatpush.bf16.msra.mxu2 %v4354_v58  ;;  %v4371_v0 = vld [vmem:[%s5832_s5 + $0xa0] sm:$0xff]  ;;  %v4370_v22 = vld [vmem:[%s5832_s5 + $0x98] sm:$0xff]  ;;  %v4368_v34 = vld [vmem:[%s5832_s5 + $0x88] sm:$0xff] }
 0x2ff   :  { %v4351_v44 = vld [vmem:[%s5832_s5] sm:$0xff]  ;;  %v4378_v19 = vld [vmem:[%s5832_s5 + $0xd8] sm:$0xff] }
 0x300   :  { %v2347_v1 = vadd.f32 %v2346_v50, %v2082_v33  ;;  %v2547_v33 = vmul.f32 0.00390625, %v2431_v26  ;;  %v2548_v40 = vmul.f32 0.00390625, %v2468_v61  ;;  %v4366_v50 = vld [vmem:[%s5832_s5 + $0x78] sm:$0xff]  ;;  %v2549_v31 = vmul.f32 0.00390625, %v2505_v14  ;;  %v4367_v45 = vld [vmem:[%s5832_s5 + $0x80] sm:$0xff]  ;;  %v4389_v61 = vld [vmem:[%s5834_s7 + $0x30] sm:$0xff] }
 0x301   :  { %2839 = vmatpush.bf16.msra.mxu1 %v3916_v17  ;;  %3126 = vmatpush.bf16.msra.mxu3 %v4366_v50  ;;  %v4377_v17 = vld [vmem:[%s5832_s5 + $0xd0] sm:$0xff]  ;;  %v2591_v26 = vld [vmem:[%s5835_s4] sm:$0xf] }
 0x302   :  { %v2348_v60 = vadd.f32 %v2347_v1, %v2083_v21  ;;  %v2554_v21 = vpack.c.bf16 %v2546_v27, %v2546_v27  ;;  %v2555_v32 = vpack.c.bf16 %v2547_v33, %v2547_v33  ;;  %v2556_v13 = vpack.c.bf16 %v2548_v40, %v2548_v40  ;;  %3118 = vmatpush.bf16.msra.mxu2 %v4353_v23 }
 0x303   :  { %v2595_v33 = vperm.slane %v2591_v26, 2 }
 0x304   :  { %v2349_v10 = vadd.f32 %v2348_v60, %v2084_v29  ;;  %v2557_v29 = vpack.c.bf16 %v2549_v31, %v2549_v31  ;;  %v2612_v60 = vunpack.c.l.b16 %v2554_v21  ;;  %v2613_v8 = vunpack.c.l.b16 %v2555_v32 }
 0x305   :  { %3127 = vmatpush.bf16.msra.mxu3 %v4365_v48  ;;  %v2614_v56 = vunpack.c.l.b16 %v2556_v13  ;;  %v2596_v32 = vperm.slane %v2591_v26, 3 }
 0x306   :  { %v2350_v39 = vadd.f32 %v2349_v10, %v2085_v51  ;;  %v2615_v10 = vunpack.c.l.b16 %v2557_v29 }
 0x308   :  { %v2351_v57 = vadd.f32 %v2350_v39, %v2086_v28  ;;  %v4374_v39 = vld [vmem:[%s5832_s5 + $0xb8] sm:$0xff] }
 0x309   :  { %3128 = vmatpush.bf16.msra.mxu3 %v4364_v62 }
 0x30a   :  { %v2352_v53 = vrot.slane %v2351_v57, 4 }
 0x30c   :  { %v2353_v36 = vadd.f32 %v2352_v53, %v2351_v57  ;;  %v4352_v57 = vld [vmem:[%s5832_s5 + $0x8] sm:$0xff]  ;;  %v4382_v53 = vld [vmem:[%s5832_s5 + $0xf8] sm:$0xff] }
 0x30d   :  { %3129 = vmatpush.bf16.msra.mxu3 %v4363_v15  ;;  %3119 = vmatpush.bf16.msra.mxu2 %v4352_v57 }
 0x30e   :  { %v2354_v52 = vrot.slane %v2353_v36, 2 }
 0x310   :  { %v2355_v20 = vadd.f32 %v2354_v52, %v2353_v36  ;;  %v4360_v36 = vld [vmem:[%s5832_s5 + $0x48] sm:$0xff]  ;;  %v4359_v52 = vld [vmem:[%s5832_s5 + $0x40] sm:$0xff] }
 0x311   :  { %3130 = vmatpush.bf16.msra.mxu3 %v4362_v47  ;;  %3120 = vmatpush.bf16.msra.mxu2 %v4351_v44  ;;  %v4402_v44 = vld [vmem:[%s5836_s8] ss:$0 sm:$0xff] }
 0x312   :  { %v2356_v6 = vrot.slane %v2355_v20, 1 }
 0x314   :  { %v2357_v43 = vadd.f32 %v2356_v6, %v2355_v20  ;;  %v4390_v20 = vld [vmem:[%s5834_s7 + $0x38] sm:$0xff]  ;;  %v2593_v6 = vperm.slane %v2591_v26, 0 }
 0x315   :  { %3131 = vmatpush.bf16.msra.mxu3 %v4361_v9 }
 0x316   :  { %v2545_v18 = vmul.f32 0.00390625, %v2357_v43  ;;  %v2594_v43 = vperm.slane %v2591_v26, 1 }
 0x318   :  { %v2553_v1 = vpack.c.bf16 %v2545_v18, %v2545_v18 }
 0x319   :  { %3132 = vmatpush.bf16.msra.mxu3 %v4360_v36 }
 0x31a   :  { %v2611_v63 = vunpack.c.l.b16 %v2553_v1 }
 0x31c   :  { %v2620_v38 = vsel %vm2619_vm3, %v2611_v63, %v5496_v59 }
 0x31d   :  { %v2622_v51 = vsel %vm2621_vm4, %v2612_v60, %v2620_v38  ;;  %3133 = vmatpush.bf16.msra.mxu3 %v4359_v52  ;;  %v4387_v38 = vld [vmem:[%s5834_s7 + $0x20] sm:$0xff] }
 0x31e   :  { %v2624_v55 = vsel %vm2623_vm5, %v2613_v8, %v2622_v51  ;;  %v4388_v8 = vld [vmem:[%s5834_s7 + $0x28] sm:$0xff]  ;;  %v4385_v51 = vld [vmem:[%s5834_s7 + $0x10] sm:$0xff] }
 0x31f   :  { %v2626_v2 = vsel %vm2625_vm6, %v2614_v56, %v2624_v55  ;;  %v4386_v56 = vld [vmem:[%s5834_s7 + $0x18] sm:$0xff]  ;;  %v4383_v55 = vld [vmem:[%s5834_s7] sm:$0xff] }
 0x320   :  { %v2628_v59 = vsel %vm2627_vm7, %v2615_v10, %v2626_v2  ;;  %v4384_v10 = vld [vmem:[%s5834_s7 + $0x8] sm:$0xff]  ;;  %v4401_v2 = vld [vmem:[%s5833_s6] ss:$0 sm:$0xff] }
 0x321   :  { %v2630_v28 = vsel %vm2629_vm8, %v2616_v11, %v2628_v59 }
 0x322   :  { %v2631_v30 = vpack.c.b16 %v2630_v28, %v2630_v28 }
 0x324   :  { %2801 = vmatmul.bf16.vlgmr.msrb.gmra.mxu1 %v2631_v30  ;;  %2814 = vmatmul.bf16.vlgmr.msrb.gmra.mxu2 %v2631_v30 }
 0x325   :  { %2827 = vmatmul.bf16.vlgmr.msrb.gmra.mxu3 %v2631_v30  ;;  %3139 = vmatpush.bf16.msrb.mxu1 %v4374_v39 }
 0x326   :  { %3152 = vmatpush.bf16.msrb.mxu2 %v4382_v53  ;;  %3235 = vmatpush.bf16.msrb.mxu3 %v4390_v20 }
 0x329   :  { %3140 = vmatpush.bf16.msrb.mxu1 %v4373_v16 }
 0x32a   :  { %3153 = vmatpush.bf16.msrb.mxu2 %v4381_v46  ;;  %3236 = vmatpush.bf16.msrb.mxu3 %v4389_v61 }
 0x32d   :  { %3141 = vmatpush.bf16.msrb.mxu1 %v4372_v24 }
 0x32e   :  { %3154 = vmatpush.bf16.msrb.mxu2 %v4380_v4  ;;  %3237 = vmatpush.bf16.msrb.mxu3 %v4388_v8 }
 0x331   :  { %3142 = vmatpush.bf16.msrb.mxu1 %v4371_v0 }
 0x332   :  { %3155 = vmatpush.bf16.msrb.mxu2 %v4379_v41  ;;  %3238 = vmatpush.bf16.msrb.mxu3 %v4387_v38 }
 0x334   :  { %2840 = vmatmul.bf16.vlgmr.msra.gmra.mxu1 %v2631_v30 }
 0x335   :  { %3143 = vmatpush.bf16.msrb.mxu1 %v4370_v22 }
 0x336   :  { %3156 = vmatpush.bf16.msrb.mxu2 %v4378_v19  ;;  %3239 = vmatpush.bf16.msrb.mxu3 %v4386_v56 }
 0x339   :  { %3144 = vmatpush.bf16.msrb.mxu1 %v4369_v3 }
 0x33a   :  { %3157 = vmatpush.bf16.msrb.mxu2 %v4377_v17  ;;  %3240 = vmatpush.bf16.msrb.mxu3 %v4385_v51 }
 0x33d   :  { %3145 = vmatpush.bf16.msrb.mxu1 %v4368_v34 }
 0x33e   :  { %3158 = vmatpush.bf16.msrb.mxu2 %v4376_v54  ;;  %3241 = vmatpush.bf16.msrb.mxu3 %v4384_v10 }
 0x341   :  { %3146 = vmatpush.bf16.msrb.mxu1 %v4367_v45 }
 0x342   :  { %3159 = vmatpush.bf16.msrb.mxu2 %v4375_v42  ;;  %3242 = vmatpush.bf16.msrb.mxu3 %v4383_v55 }
 0x3a1   :  { %v2802_v14 = vpop.f32.mrf.mxu1 }
 0x3a2   :  { %v2803_v27 = vadd.f32 %v2802_v14, %v2593_v6 }
 0x3a4   :  { %v2845_v12 = vmax.f32 %v2803_v27, 0.0 }
 0x3a6   :  { %v2849_v7 = vpack.c.bf16 %v2845_v12, %v2845_v12 }
 0x3a7   :  { %v2815_v40 = vpop.f32.mrf.mxu2 }
 0x3a8   :  { %v2816_v50 = vadd.f32 %v2815_v40, %v2594_v43  ;;  %v2828_v18 = vpop.f32.mrf.mxu3  ;;  %3121 = vmatmul.bf16.vlgmr.msra.gmra.mxu2 %v2849_v7 }
 0x3a9   :  { %v2829_v31 = vadd.f32 %v2828_v18, %v2595_v33  ;;  %v2804_v37 = vpop.f32.mrf.mxu1 }
 0x3aa   :  { %v2846_v21 = vmax.f32 %v2816_v50, 0.0 }
 0x3ab   :  { %v2847_v5 = vmax.f32 %v2829_v31, 0.0 }
 0x3ac   :  { %v2850_v48 = vpack.c.bf16 %v2846_v21, %v2846_v21 }
 0x3ad   :  { %v2851_v1 = vpack.c.bf16 %v2847_v5, %v2847_v5 }
 0x3ae   :  { %3134 = vmatmul.bf16.vlgmr.msra.gmra.mxu3 %v2850_v48 }
 0x3af   :  { %3147 = vmatmul.bf16.vlgmr.msrb.gmra.mxu1 %v2851_v1  ;;  %v2817_v13 = vpop.f32.mrf.mxu2 }
 0x3b0   :  { %v2830_v29 = vpop.f32.mrf.mxu3 }
 0x3b1   :  { %v2841_v63 = vpop.f32.mrf.mxu1 }
 0x3b2   :  { %v2842_v25 = vadd.f32 %v2841_v63, %v2596_v32 }
 0x3b4   :  { %v2848_v60 = vmax.f32 %v2842_v25, 0.0 }
 0x3b6   :  { %v2852_v49 = vpack.c.bf16 %v2848_v60, %v2848_v60 }
 0x3b8   :  { %3160 = vmatmul.bf16.vlgmr.msrb.gmra.mxu2 %v2852_v49 }
 0x3b9   :  { %v2843_v62 = vpop.f32.mrf.mxu1 }
 0x42b   :  { %v3122_v35 = vpop.f32.mrf.mxu2 }
 0x42c   :  { %v3148_v11 = vpop.f32.mrf.mxu1  ;;  %v3123_v28 = vadd.f32 %v4401_v2, %v3122_v35 }
 0x431   :  { %v3135_v15 = vpop.f32.mrf.mxu3 }
 0x432   :  { %v3136_v30 = vadd.f32 %v3135_v15, %v3123_v28 }
 0x433   :  { %v3124_v59 = vpop.f32.mrf.mxu2 }
 0x434   :  { %v3150_v39 = vpop.f32.mrf.mxu1  ;;  %v3149_v47 = vadd.f32 %v3148_v11, %v3136_v30 }
 0x439   :  { %v3137_v58 = vpop.f32.mrf.mxu3 }
 0x43b   :  { %v3161_v16 = vpop.f32.mrf.mxu2 }
 0x43c   :  { %v3162_v23 = vadd.f32 %v3161_v16, %v3149_v47 }
 0x43e   :  { %v3165_v24 = vmax.f32 %v3162_v23, 0.0 }
 0x440   :  { %v3166_v57 = vpack.c.bf16 %v3165_v24, %v3165_v24 }
 0x442   :  { %3243 = vmatmul.bf16.vlgmr.msrb.gmra.mxu3 %v3166_v57 }
 0x443   :  { %v3163_v0 = vpop.f32.mrf.mxu2 }
 0x4c5   :  { %v3244_v53 = vpop.f32.mrf.mxu3 }
 0x4c6   :  { %v3245_v22 = vadd.f32 %v4402_v44, %v3244_v53 }
 0x4c8   :  { %3248 = vst [vmem:[%s5837_s9] sm:$0xff] %v3245_v22 }
 0x4cd   :  { %v3246_v46 = vpop.f32.mrf.mxu3 }

</bundles_post_ra>
